<compile_context>
chip_gen: v6e
topology: v6e:2x2x1
jax: 0.10.0
libtpu: 0.0.40
codegen_flags: <defaults>
</compile_context>

<pallas_src>
import jax
import jax.numpy as jnp
from jax import lax
from jax.experimental import pallas as pl
from jax.experimental.pallas import tpu as pltpu


def _round_up(x, m):
    return ((x + m - 1) // m) * m


_GATE_ORDER = (0, 1, 3, 2)   # PyTorch [i, f, g, o] -> packed [i, f, o, g]


# ----------------------------- Pallas kernel -------------------------------

def _make_fused_lstm_kernel(num_layers, seq, bp, batch, hidden):
    """Fused kernel: `num_layers` LSTM layers + FC head, whole sequence."""

    def kernel(*refs):
        # refs: x, (wih, whh, b) * L, w_fc, b_fc, out, seq_scratch, gate_scratch
        x_ref = refs[0]                               # (S*Bp, Din) time-major
        w_refs = refs[1:1 + 3 * num_layers]
        wfc_ref = refs[1 + 3 * num_layers]            # (H, O)
        bfc_ref = refs[2 + 3 * num_layers]            # (1, O)
        out_ref = refs[3 + 3 * num_layers]            # (B, O)
        seq_ref = refs[4 + 3 * num_layers]            # VMEM (S*Bp, H)
        gates_ref = refs[5 + 3 * num_layers]          # VMEM (S*Bp, 4H)

        h_last = None
        for l in range(num_layers):
            wih = w_refs[3 * l][...]                  # (Din_l, 4H)
            whh = w_refs[3 * l + 1][...]              # (H,     4H)
            b = w_refs[3 * l + 2][...]                # (1,     4H)

            # ---- hoisted input projection: all timesteps at once -----------
            if l == 0:
                # K = Din = 1: VPU broadcast multiply; keep the MXU free.
                gates_ref[...] = x_ref[...] * wih + b
            else:
                gates_ref[...] = jnp.dot(
                    seq_ref[...], wih,
                    preferred_element_type=jnp.float32) + b

            write_seq = l < num_layers - 1   # last layer only needs final h

            # ---- serial recurrence: only h @ Whh + hoisted_gates[t] --------
            def step(t, carry, whh=whh, write_seq=write_seq):
                h, c = carry
                row = pl.multiple_of(t * bp, bp)            # sublane-aligned
                g = gates_ref[pl.ds(row, bp), :] + jnp.dot(
                    h, whh, preferred_element_type=jnp.float32)   # (Bp, 4H)
                # gate layout [i | f | o | g]: one wide sigmoid + one tanh.
                sig = jax.nn.sigmoid(g[:, :3 * hidden])
                i_g = sig[:, 0 * hidden:1 * hidden]
                f_g = sig[:, 1 * hidden:2 * hidden]
                o_g = sig[:, 2 * hidden:3 * hidden]
                g_g = jnp.tanh(g[:, 3 * hidden:])
                c_n = f_g * c + i_g * g_g
                h_n = o_g * jnp.tanh(c_n)
                if write_seq:
                    seq_ref[pl.ds(row, bp), :] = h_n
                return (h_n, c_n)

            carry0 = (jnp.zeros((bp, hidden), jnp.float32),
                      jnp.zeros((bp, hidden), jnp.float32))
            h_last, _ = lax.fori_loop(0, seq, step, carry0, unroll=True)

        # ---- fused FC head on the final hidden state (only HBM store) ------
        res = jnp.dot(h_last, wfc_ref[...],
                      preferred_element_type=jnp.float32) + bfc_ref[...]
        out_ref[...] = res[:batch]

    return kernel


# ------------------------------- wrapper ------------------------------------

def lstm_forward(x, kparams):
    """x: (batch, seq) float32 -> (batch, output_dim)."""
    layers = kparams["lstm"]
    w_fc_t, b_fc = kparams["fc"]
    num_layers = len(layers)
    hidden = layers[0][1].shape[0]                    # whh is (H, 4H)
    out_dim = w_fc_t.shape[1]

    x = x.astype(jnp.float32)[:, :, None]             # unsqueeze: (B, S, 1)
    batch, seq, din = x.shape
    bp = _round_up(batch, 8)                          # pad batch to 8 sublanes

    # time-major, batch sublane-padded, flattened to (S*Bp, Din)
    x_tm = jnp.transpose(x, (1, 0, 2))                # (S, B, Din)
    x_tm = jnp.pad(x_tm, ((0, 0), (0, bp - batch), (0, 0)))
    x_tm = x_tm.reshape(seq * bp, din)

    flat_inputs = [x_tm]
    in_specs = [pl.BlockSpec(x_tm.shape, lambda i: (0, 0))]
    for (wih, whh, b) in layers:
        for w in (wih, whh, b):
            flat_inputs.append(w)
            in_specs.append(pl.BlockSpec(w.shape, lambda i: (0, 0)))
    for w in (w_fc_t, b_fc):
        flat_inputs.append(w)
        in_specs.append(pl.BlockSpec(w.shape, lambda i: (0, 0)))

    kernel = _make_fused_lstm_kernel(num_layers, seq, bp, batch, hidden)

    return pl.pallas_call(
        kernel,
        out_shape=jax.ShapeDtypeStruct((batch, out_dim), jnp.float32),
        grid_spec=pltpu.PrefetchScalarGridSpec(
            num_scalar_prefetch=0,
            grid=(1,),
            in_specs=in_specs,
            out_specs=pl.BlockSpec((batch, out_dim), lambda i: (0, 0)),
            scratch_shapes=[
                pltpu.VMEM((seq * bp, hidden), jnp.float32),      # layer acts
                pltpu.VMEM((seq * bp, 4 * hidden), jnp.float32),  # hoisted proj
            ],
        ),
        compiler_params=pltpu.CompilerParams(
            dimension_semantics=("arbitrary",),
            vmem_limit_bytes=32 * 1024 * 1024),
    )(*flat_inputs)


# --------------------------- parameter handling ------------------------------

def init_params(key, input_dim, hidden_dim, num_layers, output_dim):
    """PyTorch-layout params, U(-1/sqrt(H), 1/sqrt(H)) like nn.LSTM/nn.Linear."""
    bound = 1.0 / jnp.sqrt(jnp.float32(hidden_dim))
    lstm = []
    for l in range(num_layers):
        din = input_dim if l == 0 else hidden_dim
        key, k1, k2, k3, k4 = jax.random.split(key, 5)
        w_ih = jax.random.uniform(k1, (4 * hidden_dim, din), jnp.float32,
                                  -bound, bound)
        w_hh = jax.random.uniform(k2, (4 * hidden_dim, hidden_dim), jnp.float32,
                                  -bound, bound)
        b_ih = jax.random.uniform(k3, (4 * hidden_dim,), jnp.float32,
                                  -bound, bound)
        b_hh = jax.random.uniform(k4, (4 * hidden_dim,), jnp.float32,
                                  -bound, bound)
        lstm.append((w_ih, w_hh, b_ih, b_hh))
    key, k5, k6 = jax.random.split(key, 3)
    w_fc = jax.random.uniform(k5, (output_dim, hidden_dim), jnp.float32,
                              -bound, bound)
    b_fc = jax.random.uniform(k6, (output_dim,), jnp.float32, -bound, bound)
    return {"lstm": lstm, "fc": (w_fc, b_fc)}


def pack_params(raw, input_dim, hidden_dim):
    """Transpose to right-multiply layout, gate order [i, f, o, g], no padding.

    With H=32 the packed 4*H axis is exactly one 128-lane tile, the three
    sigmoid gates are contiguous and the tanh gate is last.
    """
    h = hidden_dim
    order = jnp.asarray(_GATE_ORDER)
    lstm = []
    for l, (w_ih, w_hh, b_ih, b_hh) in enumerate(raw["lstm"]):
        din = input_dim if l == 0 else h
        w4 = w_ih.reshape(4, h, din)[order]                     # (4, H, Din)
        wih_t = jnp.transpose(w4, (2, 0, 1)).reshape(din, 4 * h)
        u4 = w_hh.reshape(4, h, h)[order]                       # (4, H, H)
        whh_t = jnp.transpose(u4, (2, 0, 1)).reshape(h, 4 * h)
        b4 = (b_ih + b_hh).reshape(4, h)[order]
        lstm.append((wih_t, whh_t, b4.reshape(1, 4 * h)))
    w_fc, b_fc = raw["fc"]
    return {"lstm": lstm, "fc": (w_fc.T, b_fc[None, :])}


# ----------------------------- pure-JAX reference ----------------------------

def lstm_reference(x, raw, hidden_dim):
    hd = hidden_dim
    x = x.astype(jnp.float32)[:, :, None]
    batch = x.shape[0]
    layer_in = jnp.transpose(x, (1, 0, 2))       # (S, B, Din)
    for (w_ih, w_hh, b_ih, b_hh) in raw["lstm"]:
        def step(carry, x_t, w_ih=w_ih, w_hh=w_hh, b_ih=b_ih, b_hh=b_hh):
            h, c = carry
            gates = x_t @ w_ih.T + h @ w_hh.T + b_ih + b_hh
            i_g = jax.nn.sigmoid(gates[:, 0 * hd:1 * hd])
            f_g = jax.nn.sigmoid(gates[:, 1 * hd:2 * hd])
            g_g = jnp.tanh(gates[:, 2 * hd:3 * hd])
            o_g = jax.nn.sigmoid(gates[:, 3 * hd:4 * hd])
            c_n = f_g * c + i_g * g_g
            h_n = o_g * jnp.tanh(c_n)
            return (h_n, c_n), h_n

        init = (jnp.zeros((batch, hd), jnp.float32),
                jnp.zeros((batch, hd), jnp.float32))
        _, layer_in = lax.scan(step, init, layer_in)
    w_fc, b_fc = raw["fc"]
    return layer_in[-1] @ w_fc.T + b_fc


# ---------------------------------- main -------------------------------------

if __name__ == "__main__":
    batch, seq = 2, 8
    input_dim, hidden_dim, num_layers, output_dim = 1, 32, 2, 4

    key = jax.random.PRNGKey(0)
    key, xk = jax.random.split(key)
    x = jax.random.normal(xk, (batch, seq), jnp.float32)

    raw = init_params(key, input_dim, hidden_dim, num_layers, output_dim)
    packed = pack_params(raw, input_dim, hidden_dim)

    out = jax.block_until_ready(lstm_forward(x, packed))
    ref = lstm_reference(x, raw, hidden_dim)

    assert out.shape == (batch, output_dim)
    assert jnp.allclose(out, ref, atol=1e-5, rtol=1e-5)

    print("KERNEL_OK")
</pallas_src>

<mosaic_0001>
module attributes {stable_mosaic.version = 11 : i64} {
  func.func @kernel(%arg0: i32, %arg1: memref<64x1xf32, #tpu.memory_space<vmem>>, %arg2: memref<1x128xf32, #tpu.memory_space<vmem>>, %arg3: memref<32x128xf32, #tpu.memory_space<vmem>>, %arg4: memref<1x128xf32, #tpu.memory_space<vmem>>, %arg5: memref<32x128xf32, #tpu.memory_space<vmem>>, %arg6: memref<32x128xf32, #tpu.memory_space<vmem>>, %arg7: memref<1x128xf32, #tpu.memory_space<vmem>>, %arg8: memref<32x4xf32, #tpu.memory_space<vmem>>, %arg9: memref<1x4xf32, #tpu.memory_space<vmem>>, %arg10: memref<2x4xf32, #tpu.memory_space<vmem>>, %arg11: memref<64x32xf32, #tpu.memory_space<vmem>>, %arg12: memref<64x128xf32, #tpu.memory_space<vmem>>) attributes {dimension_semantics = [#tpu.dimension_semantics<arbitrary>], iteration_bounds = array<i64: 1>, scalar_prefetch = 0 : i64, scratch_operands = 2 : i64, tpu.core_type = #tpu.core_type<tc>, window_params = [{pipeline_mode = #tpu.pipeline_mode<synchronous>, transform_indices = @transform_0, window_bounds = array<i64: 64, 1>}, {pipeline_mode = #tpu.pipeline_mode<synchronous>, transform_indices = @transform_1, window_bounds = array<i64: 1, 128>}, {pipeline_mode = #tpu.pipeline_mode<synchronous>, transform_indices = @transform_2, window_bounds = array<i64: 32, 128>}, {pipeline_mode = #tpu.pipeline_mode<synchronous>, transform_indices = @transform_3, window_bounds = array<i64: 1, 128>}, {pipeline_mode = #tpu.pipeline_mode<synchronous>, transform_indices = @transform_4, window_bounds = array<i64: 32, 128>}, {pipeline_mode = #tpu.pipeline_mode<synchronous>, transform_indices = @transform_5, window_bounds = array<i64: 32, 128>}, {pipeline_mode = #tpu.pipeline_mode<synchronous>, transform_indices = @transform_6, window_bounds = array<i64: 1, 128>}, {pipeline_mode = #tpu.pipeline_mode<synchronous>, transform_indices = @transform_7, window_bounds = array<i64: 32, 4>}, {pipeline_mode = #tpu.pipeline_mode<synchronous>, transform_indices = @transform_8, window_bounds = array<i64: 1, 4>}, {pipeline_mode = #tpu.pipeline_mode<synchronous>, transform_indices = @transform_9, window_bounds = array<i64: 2, 4>}]} {
    %c0 = arith.constant 0 : index
    %c0_0 = arith.constant 0 : index
    %0 = vector.load %arg2[%c0, %c0_0] : memref<1x128xf32, #tpu.memory_space<vmem>>, vector<1x128xf32>
    %c0_1 = arith.constant 0 : index
    %c0_2 = arith.constant 0 : index
    %1 = vector.load %arg3[%c0_1, %c0_2] : memref<32x128xf32, #tpu.memory_space<vmem>>, vector<32x128xf32>
    %c0_3 = arith.constant 0 : index
    %c0_4 = arith.constant 0 : index
    %2 = vector.load %arg4[%c0_3, %c0_4] : memref<1x128xf32, #tpu.memory_space<vmem>>, vector<1x128xf32>
    %c0_5 = arith.constant 0 : index
    %c0_6 = arith.constant 0 : index
    %3 = vector.load %arg1[%c0_5, %c0_6] : memref<64x1xf32, #tpu.memory_space<vmem>>, vector<64x1xf32>
    %4 = vector.broadcast %3 : vector<64x1xf32> to vector<64x128xf32>
    %5 = vector.broadcast %0 : vector<1x128xf32> to vector<64x128xf32>
    %6 = arith.mulf %4, %5 : vector<64x128xf32>
    %7 = vector.broadcast %2 : vector<1x128xf32> to vector<64x128xf32>
    %8 = arith.addf %6, %7 : vector<64x128xf32>
    %c0_7 = arith.constant 0 : index
    %c0_8 = arith.constant 0 : index
    %9 = vector.load %arg12[%c0_7, %c0_8] : memref<64x128xf32, #tpu.memory_space<vmem>>, vector<64x128xf32>
    tpu.vector_store %arg12[%c0_7, %c0_8], %8 {strides = array<i32>} : memref<64x128xf32, #tpu.memory_space<vmem>>, vector<64x128xf32>,
    %cst = arith.constant 0.000000e+00 : f32
    %10 = vector.broadcast %cst : f32 to vector<8x32xf32>
    %cst_9 = arith.constant 0.000000e+00 : f32
    %11 = vector.broadcast %cst_9 : f32 to vector<8x32xf32>
    %c0_i32 = arith.constant 0 : i32
    %c8_i32 = arith.constant 8 : i32
    %12 = arith.muli %c0_i32, %c8_i32 : i32
    %13 = tpu.assume_multiple %12, 8 : i32
    %14 = arith.index_cast %13 : i32 to index
    %c0_10 = arith.constant 0 : index
    %15 = vector.load %arg12[%14, %c0_10] : memref<64x128xf32, #tpu.memory_space<vmem>>, vector<8x128xf32>
    %cst_11 = arith.constant dense<0.000000e+00> : vector<8x128xf32>
    %16 = tpu.matmul %10, %1, %cst_11 {dimension_numbers = #tpu.dot_dimension_numbers<[1], [0], [0], [1], [0, 0, 1, 1], [], []>} : vector<8x32xf32>, vector<32x128xf32>, vector<8x128xf32> -> vector<8x128xf32>
    %17 = arith.addf %15, %16 : vector<8x128xf32>
    %18 = vector.extract_strided_slice %17 {offsets = [0, 0], sizes = [8, 96], strides = [1, 1]} : vector<8x128xf32> to vector<8x96xf32>
    %19 = arith.negf %18 : vector<8x96xf32>
    %20 = math.exp %19 : vector<8x96xf32>
    %cst_12 = arith.constant 1.000000e+00 : f32
    %21 = vector.broadcast %cst_12 : f32 to vector<8x96xf32>
    %22 = arith.addf %21, %20 : vector<8x96xf32>
    %23 = arith.divf %21, %22 : vector<8x96xf32>
    %24 = vector.extract_strided_slice %23 {offsets = [0, 0], sizes = [8, 32], strides = [1, 1]} : vector<8x96xf32> to vector<8x32xf32>
    %25 = vector.extract_strided_slice %23 {offsets = [0, 32], sizes = [8, 32], strides = [1, 1]} : vector<8x96xf32> to vector<8x32xf32>
    %26 = vector.extract_strided_slice %23 {offsets = [0, 64], sizes = [8, 32], strides = [1, 1]} : vector<8x96xf32> to vector<8x32xf32>
    %27 = vector.extract_strided_slice %17 {offsets = [0, 96], sizes = [8, 32], strides = [1, 1]} : vector<8x128xf32> to vector<8x32xf32>
    %28 = math.tanh %27 : vector<8x32xf32>
    %29 = arith.mulf %25, %11 : vector<8x32xf32>
    %30 = arith.mulf %24, %28 : vector<8x32xf32>
    %31 = arith.addf %29, %30 : vector<8x32xf32>
    %32 = math.tanh %31 : vector<8x32xf32>
    %33 = arith.mulf %26, %32 : vector<8x32xf32>
    %34 = arith.index_cast %13 : i32 to index
    %c0_13 = arith.constant 0 : index
    %35 = vector.load %arg11[%34, %c0_13] : memref<64x32xf32, #tpu.memory_space<vmem>>, vector<8x32xf32>
    tpu.vector_store %arg11[%34, %c0_13], %33 {strides = array<i32>} : memref<64x32xf32, #tpu.memory_space<vmem>>, vector<8x32xf32>,
    %c1_i32 = arith.constant 1 : i32
    %c8_i32_14 = arith.constant 8 : i32
    %36 = arith.muli %c1_i32, %c8_i32_14 : i32
    %37 = tpu.assume_multiple %36, 8 : i32
    %38 = arith.index_cast %37 : i32 to index
    %c0_15 = arith.constant 0 : index
    %39 = vector.load %arg12[%38, %c0_15] : memref<64x128xf32, #tpu.memory_space<vmem>>, vector<8x128xf32>
    %cst_16 = arith.constant dense<0.000000e+00> : vector<8x128xf32>
    %40 = tpu.matmul %33, %1, %cst_16 {dimension_numbers = #tpu.dot_dimension_numbers<[1], [0], [0], [1], [0, 0, 1, 1], [], []>} : vector<8x32xf32>, vector<32x128xf32>, vector<8x128xf32> -> vector<8x128xf32>
    %41 = arith.addf %39, %40 : vector<8x128xf32>
    %42 = vector.extract_strided_slice %41 {offsets = [0, 0], sizes = [8, 96], strides = [1, 1]} : vector<8x128xf32> to vector<8x96xf32>
    %43 = arith.negf %42 : vector<8x96xf32>
    %44 = math.exp %43 : vector<8x96xf32>
    %cst_17 = arith.constant 1.000000e+00 : f32
    %45 = vector.broadcast %cst_17 : f32 to vector<8x96xf32>
    %46 = arith.addf %45, %44 : vector<8x96xf32>
    %47 = arith.divf %45, %46 : vector<8x96xf32>
    %48 = vector.extract_strided_slice %47 {offsets = [0, 0], sizes = [8, 32], strides = [1, 1]} : vector<8x96xf32> to vector<8x32xf32>
    %49 = vector.extract_strided_slice %47 {offsets = [0, 32], sizes = [8, 32], strides = [1, 1]} : vector<8x96xf32> to vector<8x32xf32>
    %50 = vector.extract_strided_slice %47 {offsets = [0, 64], sizes = [8, 32], strides = [1, 1]} : vector<8x96xf32> to vector<8x32xf32>
    %51 = vector.extract_strided_slice %41 {offsets = [0, 96], sizes = [8, 32], strides = [1, 1]} : vector<8x128xf32> to vector<8x32xf32>
    %52 = math.tanh %51 : vector<8x32xf32>
    %53 = arith.mulf %49, %31 : vector<8x32xf32>
    %54 = arith.mulf %48, %52 : vector<8x32xf32>
    %55 = arith.addf %53, %54 : vector<8x32xf32>
    %56 = math.tanh %55 : vector<8x32xf32>
    %57 = arith.mulf %50, %56 : vector<8x32xf32>
    %58 = arith.index_cast %37 : i32 to index
    %c0_18 = arith.constant 0 : index
    %59 = vector.load %arg11[%58, %c0_18] : memref<64x32xf32, #tpu.memory_space<vmem>>, vector<8x32xf32>
    tpu.vector_store %arg11[%58, %c0_18], %57 {strides = array<i32>} : memref<64x32xf32, #tpu.memory_space<vmem>>, vector<8x32xf32>,
    %c2_i32 = arith.constant 2 : i32
    %c8_i32_19 = arith.constant 8 : i32
    %60 = arith.muli %c2_i32, %c8_i32_19 : i32
    %61 = tpu.assume_multiple %60, 8 : i32
    %62 = arith.index_cast %61 : i32 to index
    %c0_20 = arith.constant 0 : index
    %63 = vector.load %arg12[%62, %c0_20] : memref<64x128xf32, #tpu.memory_space<vmem>>, vector<8x128xf32>
    %cst_21 = arith.constant dense<0.000000e+00> : vector<8x128xf32>
    %64 = tpu.matmul %57, %1, %cst_21 {dimension_numbers = #tpu.dot_dimension_numbers<[1], [0], [0], [1], [0, 0, 1, 1], [], []>} : vector<8x32xf32>, vector<32x128xf32>, vector<8x128xf32> -> vector<8x128xf32>
    %65 = arith.addf %63, %64 : vector<8x128xf32>
    %66 = vector.extract_strided_slice %65 {offsets = [0, 0], sizes = [8, 96], strides = [1, 1]} : vector<8x128xf32> to vector<8x96xf32>
    %67 = arith.negf %66 : vector<8x96xf32>
    %68 = math.exp %67 : vector<8x96xf32>
    %cst_22 = arith.constant 1.000000e+00 : f32
    %69 = vector.broadcast %cst_22 : f32 to vector<8x96xf32>
    %70 = arith.addf %69, %68 : vector<8x96xf32>
    %71 = arith.divf %69, %70 : vector<8x96xf32>
    %72 = vector.extract_strided_slice %71 {offsets = [0, 0], sizes = [8, 32], strides = [1, 1]} : vector<8x96xf32> to vector<8x32xf32>
    %73 = vector.extract_strided_slice %71 {offsets = [0, 32], sizes = [8, 32], strides = [1, 1]} : vector<8x96xf32> to vector<8x32xf32>
    %74 = vector.extract_strided_slice %71 {offsets = [0, 64], sizes = [8, 32], strides = [1, 1]} : vector<8x96xf32> to vector<8x32xf32>
    %75 = vector.extract_strided_slice %65 {offsets = [0, 96], sizes = [8, 32], strides = [1, 1]} : vector<8x128xf32> to vector<8x32xf32>
    %76 = math.tanh %75 : vector<8x32xf32>
    %77 = arith.mulf %73, %55 : vector<8x32xf32>
    %78 = arith.mulf %72, %76 : vector<8x32xf32>
    %79 = arith.addf %77, %78 : vector<8x32xf32>
    %80 = math.tanh %79 : vector<8x32xf32>
    %81 = arith.mulf %74, %80 : vector<8x32xf32>
    %82 = arith.index_cast %61 : i32 to index
    %c0_23 = arith.constant 0 : index
    %83 = vector.load %arg11[%82, %c0_23] : memref<64x32xf32, #tpu.memory_space<vmem>>, vector<8x32xf32>
    tpu.vector_store %arg11[%82, %c0_23], %81 {strides = array<i32>} : memref<64x32xf32, #tpu.memory_space<vmem>>, vector<8x32xf32>,
    %c3_i32 = arith.constant 3 : i32
    %c8_i32_24 = arith.constant 8 : i32
    %84 = arith.muli %c3_i32, %c8_i32_24 : i32
    %85 = tpu.assume_multiple %84, 8 : i32
    %86 = arith.index_cast %85 : i32 to index
    %c0_25 = arith.constant 0 : index
    %87 = vector.load %arg12[%86, %c0_25] : memref<64x128xf32, #tpu.memory_space<vmem>>, vector<8x128xf32>
    %cst_26 = arith.constant dense<0.000000e+00> : vector<8x128xf32>
    %88 = tpu.matmul %81, %1, %cst_26 {dimension_numbers = #tpu.dot_dimension_numbers<[1], [0], [0], [1], [0, 0, 1, 1], [], []>} : vector<8x32xf32>, vector<32x128xf32>, vector<8x128xf32> -> vector<8x128xf32>
    %89 = arith.addf %87, %88 : vector<8x128xf32>
    %90 = vector.extract_strided_slice %89 {offsets = [0, 0], sizes = [8, 96], strides = [1, 1]} : vector<8x128xf32> to vector<8x96xf32>
    %91 = arith.negf %90 : vector<8x96xf32>
    %92 = math.exp %91 : vector<8x96xf32>
    %cst_27 = arith.constant 1.000000e+00 : f32
    %93 = vector.broadcast %cst_27 : f32 to vector<8x96xf32>
    %94 = arith.addf %93, %92 : vector<8x96xf32>
    %95 = arith.divf %93, %94 : vector<8x96xf32>
    %96 = vector.extract_strided_slice %95 {offsets = [0, 0], sizes = [8, 32], strides = [1, 1]} : vector<8x96xf32> to vector<8x32xf32>
    %97 = vector.extract_strided_slice %95 {offsets = [0, 32], sizes = [8, 32], strides = [1, 1]} : vector<8x96xf32> to vector<8x32xf32>
    %98 = vector.extract_strided_slice %95 {offsets = [0, 64], sizes = [8, 32], strides = [1, 1]} : vector<8x96xf32> to vector<8x32xf32>
    %99 = vector.extract_strided_slice %89 {offsets = [0, 96], sizes = [8, 32], strides = [1, 1]} : vector<8x128xf32> to vector<8x32xf32>
    %100 = math.tanh %99 : vector<8x32xf32>
    %101 = arith.mulf %97, %79 : vector<8x32xf32>
    %102 = arith.mulf %96, %100 : vector<8x32xf32>
    %103 = arith.addf %101, %102 : vector<8x32xf32>
    %104 = math.tanh %103 : vector<8x32xf32>
    %105 = arith.mulf %98, %104 : vector<8x32xf32>
    %106 = arith.index_cast %85 : i32 to index
    %c0_28 = arith.constant 0 : index
    %107 = vector.load %arg11[%106, %c0_28] : memref<64x32xf32, #tpu.memory_space<vmem>>, vector<8x32xf32>
    tpu.vector_store %arg11[%106, %c0_28], %105 {strides = array<i32>} : memref<64x32xf32, #tpu.memory_space<vmem>>, vector<8x32xf32>,
    %c4_i32 = arith.constant 4 : i32
    %c8_i32_29 = arith.constant 8 : i32
    %108 = arith.muli %c4_i32, %c8_i32_29 : i32
    %109 = tpu.assume_multiple %108, 8 : i32
    %110 = arith.index_cast %109 : i32 to index
    %c0_30 = arith.constant 0 : index
    %111 = vector.load %arg12[%110, %c0_30] : memref<64x128xf32, #tpu.memory_space<vmem>>, vector<8x128xf32>
    %cst_31 = arith.constant dense<0.000000e+00> : vector<8x128xf32>
    %112 = tpu.matmul %105, %1, %cst_31 {dimension_numbers = #tpu.dot_dimension_numbers<[1], [0], [0], [1], [0, 0, 1, 1], [], []>} : vector<8x32xf32>, vector<32x128xf32>, vector<8x128xf32> -> vector<8x128xf32>
    %113 = arith.addf %111, %112 : vector<8x128xf32>
    %114 = vector.extract_strided_slice %113 {offsets = [0, 0], sizes = [8, 96], strides = [1, 1]} : vector<8x128xf32> to vector<8x96xf32>
    %115 = arith.negf %114 : vector<8x96xf32>
    %116 = math.exp %115 : vector<8x96xf32>
    %cst_32 = arith.constant 1.000000e+00 : f32
    %117 = vector.broadcast %cst_32 : f32 to vector<8x96xf32>
    %118 = arith.addf %117, %116 : vector<8x96xf32>
    %119 = arith.divf %117, %118 : vector<8x96xf32>
    %120 = vector.extract_strided_slice %119 {offsets = [0, 0], sizes = [8, 32], strides = [1, 1]} : vector<8x96xf32> to vector<8x32xf32>
    %121 = vector.extract_strided_slice %119 {offsets = [0, 32], sizes = [8, 32], strides = [1, 1]} : vector<8x96xf32> to vector<8x32xf32>
    %122 = vector.extract_strided_slice %119 {offsets = [0, 64], sizes = [8, 32], strides = [1, 1]} : vector<8x96xf32> to vector<8x32xf32>
    %123 = vector.extract_strided_slice %113 {offsets = [0, 96], sizes = [8, 32], strides = [1, 1]} : vector<8x128xf32> to vector<8x32xf32>
    %124 = math.tanh %123 : vector<8x32xf32>
    %125 = arith.mulf %121, %103 : vector<8x32xf32>
    %126 = arith.mulf %120, %124 : vector<8x32xf32>
    %127 = arith.addf %125, %126 : vector<8x32xf32>
    %128 = math.tanh %127 : vector<8x32xf32>
    %129 = arith.mulf %122, %128 : vector<8x32xf32>
    %130 = arith.index_cast %109 : i32 to index
    %c0_33 = arith.constant 0 : index
    %131 = vector.load %arg11[%130, %c0_33] : memref<64x32xf32, #tpu.memory_space<vmem>>, vector<8x32xf32>
    tpu.vector_store %arg11[%130, %c0_33], %129 {strides = array<i32>} : memref<64x32xf32, #tpu.memory_space<vmem>>, vector<8x32xf32>,
    %c5_i32 = arith.constant 5 : i32
    %c8_i32_34 = arith.constant 8 : i32
    %132 = arith.muli %c5_i32, %c8_i32_34 : i32
    %133 = tpu.assume_multiple %132, 8 : i32
    %134 = arith.index_cast %133 : i32 to index
    %c0_35 = arith.constant 0 : index
    %135 = vector.load %arg12[%134, %c0_35] : memref<64x128xf32, #tpu.memory_space<vmem>>, vector<8x128xf32>
    %cst_36 = arith.constant dense<0.000000e+00> : vector<8x128xf32>
    %136 = tpu.matmul %129, %1, %cst_36 {dimension_numbers = #tpu.dot_dimension_numbers<[1], [0], [0], [1], [0, 0, 1, 1], [], []>} : vector<8x32xf32>, vector<32x128xf32>, vector<8x128xf32> -> vector<8x128xf32>
    %137 = arith.addf %135, %136 : vector<8x128xf32>
    %138 = vector.extract_strided_slice %137 {offsets = [0, 0], sizes = [8, 96], strides = [1, 1]} : vector<8x128xf32> to vector<8x96xf32>
    %139 = arith.negf %138 : vector<8x96xf32>
    %140 = math.exp %139 : vector<8x96xf32>
    %cst_37 = arith.constant 1.000000e+00 : f32
    %141 = vector.broadcast %cst_37 : f32 to vector<8x96xf32>
    %142 = arith.addf %141, %140 : vector<8x96xf32>
    %143 = arith.divf %141, %142 : vector<8x96xf32>
    %144 = vector.extract_strided_slice %143 {offsets = [0, 0], sizes = [8, 32], strides = [1, 1]} : vector<8x96xf32> to vector<8x32xf32>
    %145 = vector.extract_strided_slice %143 {offsets = [0, 32], sizes = [8, 32], strides = [1, 1]} : vector<8x96xf32> to vector<8x32xf32>
    %146 = vector.extract_strided_slice %143 {offsets = [0, 64], sizes = [8, 32], strides = [1, 1]} : vector<8x96xf32> to vector<8x32xf32>
    %147 = vector.extract_strided_slice %137 {offsets = [0, 96], sizes = [8, 32], strides = [1, 1]} : vector<8x128xf32> to vector<8x32xf32>
    %148 = math.tanh %147 : vector<8x32xf32>
    %149 = arith.mulf %145, %127 : vector<8x32xf32>
    %150 = arith.mulf %144, %148 : vector<8x32xf32>
    %151 = arith.addf %149, %150 : vector<8x32xf32>
    %152 = math.tanh %151 : vector<8x32xf32>
    %153 = arith.mulf %146, %152 : vector<8x32xf32>
    %154 = arith.index_cast %133 : i32 to index
    %c0_38 = arith.constant 0 : index
    %155 = vector.load %arg11[%154, %c0_38] : memref<64x32xf32, #tpu.memory_space<vmem>>, vector<8x32xf32>
    tpu.vector_store %arg11[%154, %c0_38], %153 {strides = array<i32>} : memref<64x32xf32, #tpu.memory_space<vmem>>, vector<8x32xf32>,
    %c6_i32 = arith.constant 6 : i32
    %c8_i32_39 = arith.constant 8 : i32
    %156 = arith.muli %c6_i32, %c8_i32_39 : i32
    %157 = tpu.assume_multiple %156, 8 : i32
    %158 = arith.index_cast %157 : i32 to index
    %c0_40 = arith.constant 0 : index
    %159 = vector.load %arg12[%158, %c0_40] : memref<64x128xf32, #tpu.memory_space<vmem>>, vector<8x128xf32>
    %cst_41 = arith.constant dense<0.000000e+00> : vector<8x128xf32>
    %160 = tpu.matmul %153, %1, %cst_41 {dimension_numbers = #tpu.dot_dimension_numbers<[1], [0], [0], [1], [0, 0, 1, 1], [], []>} : vector<8x32xf32>, vector<32x128xf32>, vector<8x128xf32> -> vector<8x128xf32>
    %161 = arith.addf %159, %160 : vector<8x128xf32>
    %162 = vector.extract_strided_slice %161 {offsets = [0, 0], sizes = [8, 96], strides = [1, 1]} : vector<8x128xf32> to vector<8x96xf32>
    %163 = arith.negf %162 : vector<8x96xf32>
    %164 = math.exp %163 : vector<8x96xf32>
    %cst_42 = arith.constant 1.000000e+00 : f32
    %165 = vector.broadcast %cst_42 : f32 to vector<8x96xf32>
    %166 = arith.addf %165, %164 : vector<8x96xf32>
    %167 = arith.divf %165, %166 : vector<8x96xf32>
    %168 = vector.extract_strided_slice %167 {offsets = [0, 0], sizes = [8, 32], strides = [1, 1]} : vector<8x96xf32> to vector<8x32xf32>
    %169 = vector.extract_strided_slice %167 {offsets = [0, 32], sizes = [8, 32], strides = [1, 1]} : vector<8x96xf32> to vector<8x32xf32>
    %170 = vector.extract_strided_slice %167 {offsets = [0, 64], sizes = [8, 32], strides = [1, 1]} : vector<8x96xf32> to vector<8x32xf32>
    %171 = vector.extract_strided_slice %161 {offsets = [0, 96], sizes = [8, 32], strides = [1, 1]} : vector<8x128xf32> to vector<8x32xf32>
    %172 = math.tanh %171 : vector<8x32xf32>
    %173 = arith.mulf %169, %151 : vector<8x32xf32>
    %174 = arith.mulf %168, %172 : vector<8x32xf32>
    %175 = arith.addf %173, %174 : vector<8x32xf32>
    %176 = math.tanh %175 : vector<8x32xf32>
    %177 = arith.mulf %170, %176 : vector<8x32xf32>
    %178 = arith.index_cast %157 : i32 to index
    %c0_43 = arith.constant 0 : index
    %179 = vector.load %arg11[%178, %c0_43] : memref<64x32xf32, #tpu.memory_space<vmem>>, vector<8x32xf32>
    tpu.vector_store %arg11[%178, %c0_43], %177 {strides = array<i32>} : memref<64x32xf32, #tpu.memory_space<vmem>>, vector<8x32xf32>,
    %c7_i32 = arith.constant 7 : i32
    %c8_i32_44 = arith.constant 8 : i32
    %180 = arith.muli %c7_i32, %c8_i32_44 : i32
    %181 = tpu.assume_multiple %180, 8 : i32
    %182 = arith.index_cast %181 : i32 to index
    %c0_45 = arith.constant 0 : index
    %183 = vector.load %arg12[%182, %c0_45] : memref<64x128xf32, #tpu.memory_space<vmem>>, vector<8x128xf32>
    %cst_46 = arith.constant dense<0.000000e+00> : vector<8x128xf32>
    %184 = tpu.matmul %177, %1, %cst_46 {dimension_numbers = #tpu.dot_dimension_numbers<[1], [0], [0], [1], [0, 0, 1, 1], [], []>} : vector<8x32xf32>, vector<32x128xf32>, vector<8x128xf32> -> vector<8x128xf32>
    %185 = arith.addf %183, %184 : vector<8x128xf32>
    %186 = vector.extract_strided_slice %185 {offsets = [0, 0], sizes = [8, 96], strides = [1, 1]} : vector<8x128xf32> to vector<8x96xf32>
    %187 = arith.negf %186 : vector<8x96xf32>
    %188 = math.exp %187 : vector<8x96xf32>
    %cst_47 = arith.constant 1.000000e+00 : f32
    %189 = vector.broadcast %cst_47 : f32 to vector<8x96xf32>
    %190 = arith.addf %189, %188 : vector<8x96xf32>
    %191 = arith.divf %189, %190 : vector<8x96xf32>
    %192 = vector.extract_strided_slice %191 {offsets = [0, 0], sizes = [8, 32], strides = [1, 1]} : vector<8x96xf32> to vector<8x32xf32>
    %193 = vector.extract_strided_slice %191 {offsets = [0, 32], sizes = [8, 32], strides = [1, 1]} : vector<8x96xf32> to vector<8x32xf32>
    %194 = vector.extract_strided_slice %191 {offsets = [0, 64], sizes = [8, 32], strides = [1, 1]} : vector<8x96xf32> to vector<8x32xf32>
    %195 = vector.extract_strided_slice %185 {offsets = [0, 96], sizes = [8, 32], strides = [1, 1]} : vector<8x128xf32> to vector<8x32xf32>
    %196 = math.tanh %195 : vector<8x32xf32>
    %197 = arith.mulf %193, %175 : vector<8x32xf32>
    %198 = arith.mulf %192, %196 : vector<8x32xf32>
    %199 = arith.addf %197, %198 : vector<8x32xf32>
    %200 = math.tanh %199 : vector<8x32xf32>
    %201 = arith.mulf %194, %200 : vector<8x32xf32>
    %202 = arith.index_cast %181 : i32 to index
    %c0_48 = arith.constant 0 : index
    %203 = vector.load %arg11[%202, %c0_48] : memref<64x32xf32, #tpu.memory_space<vmem>>, vector<8x32xf32>
    tpu.vector_store %arg11[%202, %c0_48], %201 {strides = array<i32>} : memref<64x32xf32, #tpu.memory_space<vmem>>, vector<8x32xf32>,
    %c8_i32_49 = arith.constant 8 : i32
    %c0_50 = arith.constant 0 : index
    %c0_51 = arith.constant 0 : index
    %204 = vector.load %arg5[%c0_50, %c0_51] : memref<32x128xf32, #tpu.memory_space<vmem>>, vector<32x128xf32>
    %c0_52 = arith.constant 0 : index
    %c0_53 = arith.constant 0 : index
    %205 = vector.load %arg6[%c0_52, %c0_53] : memref<32x128xf32, #tpu.memory_space<vmem>>, vector<32x128xf32>
    %c0_54 = arith.constant 0 : index
    %c0_55 = arith.constant 0 : index
    %206 = vector.load %arg7[%c0_54, %c0_55] : memref<1x128xf32, #tpu.memory_space<vmem>>, vector<1x128xf32>
    %c0_56 = arith.constant 0 : index
    %c0_57 = arith.constant 0 : index
    %207 = vector.load %arg11[%c0_56, %c0_57] : memref<64x32xf32, #tpu.memory_space<vmem>>, vector<64x32xf32>
    %cst_58 = arith.constant dense<0.000000e+00> : vector<64x128xf32>
    %208 = tpu.matmul %207, %204, %cst_58 {dimension_numbers = #tpu.dot_dimension_numbers<[1], [0], [0], [1], [0, 0, 1, 1], [], []>} : vector<64x32xf32>, vector<32x128xf32>, vector<64x128xf32> -> vector<64x128xf32>
    %209 = vector.broadcast %206 : vector<1x128xf32> to vector<64x128xf32>
    %210 = arith.addf %208, %209 : vector<64x128xf32>
    %c0_59 = arith.constant 0 : index
    %c0_60 = arith.constant 0 : index
    %211 = vector.load %arg12[%c0_59, %c0_60] : memref<64x128xf32, #tpu.memory_space<vmem>>, vector<64x128xf32>
    tpu.vector_store %arg12[%c0_59, %c0_60], %210 {strides = array<i32>} : memref<64x128xf32, #tpu.memory_space<vmem>>, vector<64x128xf32>,
    %cst_61 = arith.constant 0.000000e+00 : f32
    %212 = vector.broadcast %cst_61 : f32 to vector<8x32xf32>
    %cst_62 = arith.constant 0.000000e+00 : f32
    %213 = vector.broadcast %cst_62 : f32 to vector<8x32xf32>
    %c0_i32_63 = arith.constant 0 : i32
    %c8_i32_64 = arith.constant 8 : i32
    %214 = arith.muli %c0_i32_63, %c8_i32_64 : i32
    %215 = tpu.assume_multiple %214, 8 : i32
    %216 = arith.index_cast %215 : i32 to index
    %c0_65 = arith.constant 0 : index
    %217 = vector.load %arg12[%216, %c0_65] : memref<64x128xf32, #tpu.memory_space<vmem>>, vector<8x128xf32>
    %cst_66 = arith.constant dense<0.000000e+00> : vector<8x128xf32>
    %218 = tpu.matmul %212, %205, %cst_66 {dimension_numbers = #tpu.dot_dimension_numbers<[1], [0], [0], [1], [0, 0, 1, 1], [], []>} : vector<8x32xf32>, vector<32x128xf32>, vector<8x128xf32> -> vector<8x128xf32>
    %219 = arith.addf %217, %218 : vector<8x128xf32>
    %220 = vector.extract_strided_slice %219 {offsets = [0, 0], sizes = [8, 96], strides = [1, 1]} : vector<8x128xf32> to vector<8x96xf32>
    %221 = arith.negf %220 : vector<8x96xf32>
    %222 = math.exp %221 : vector<8x96xf32>
    %cst_67 = arith.constant 1.000000e+00 : f32
    %223 = vector.broadcast %cst_67 : f32 to vector<8x96xf32>
    %224 = arith.addf %223, %222 : vector<8x96xf32>
    %225 = arith.divf %223, %224 : vector<8x96xf32>
    %226 = vector.extract_strided_slice %225 {offsets = [0, 0], sizes = [8, 32], strides = [1, 1]} : vector<8x96xf32> to vector<8x32xf32>
    %227 = vector.extract_strided_slice %225 {offsets = [0, 32], sizes = [8, 32], strides = [1, 1]} : vector<8x96xf32> to vector<8x32xf32>
    %228 = vector.extract_strided_slice %225 {offsets = [0, 64], sizes = [8, 32], strides = [1, 1]} : vector<8x96xf32> to vector<8x32xf32>
    %229 = vector.extract_strided_slice %219 {offsets = [0, 96], sizes = [8, 32], strides = [1, 1]} : vector<8x128xf32> to vector<8x32xf32>
    %230 = math.tanh %229 : vector<8x32xf32>
    %231 = arith.mulf %227, %213 : vector<8x32xf32>
    %232 = arith.mulf %226, %230 : vector<8x32xf32>
    %233 = arith.addf %231, %232 : vector<8x32xf32>
    %234 = math.tanh %233 : vector<8x32xf32>
    %235 = arith.mulf %228, %234 : vector<8x32xf32>
    %c1_i32_68 = arith.constant 1 : i32
    %c8_i32_69 = arith.constant 8 : i32
    %236 = arith.muli %c1_i32_68, %c8_i32_69 : i32
    %237 = tpu.assume_multiple %236, 8 : i32
    %238 = arith.index_cast %237 : i32 to index
    %c0_70 = arith.constant 0 : index
    %239 = vector.load %arg12[%238, %c0_70] : memref<64x128xf32, #tpu.memory_space<vmem>>, vector<8x128xf32>
    %cst_71 = arith.constant dense<0.000000e+00> : vector<8x128xf32>
    %240 = tpu.matmul %235, %205, %cst_71 {dimension_numbers = #tpu.dot_dimension_numbers<[1], [0], [0], [1], [0, 0, 1, 1], [], []>} : vector<8x32xf32>, vector<32x128xf32>, vector<8x128xf32> -> vector<8x128xf32>
    %241 = arith.addf %239, %240 : vector<8x128xf32>
    %242 = vector.extract_strided_slice %241 {offsets = [0, 0], sizes = [8, 96], strides = [1, 1]} : vector<8x128xf32> to vector<8x96xf32>
    %243 = arith.negf %242 : vector<8x96xf32>
    %244 = math.exp %243 : vector<8x96xf32>
    %cst_72 = arith.constant 1.000000e+00 : f32
    %245 = vector.broadcast %cst_72 : f32 to vector<8x96xf32>
    %246 = arith.addf %245, %244 : vector<8x96xf32>
    %247 = arith.divf %245, %246 : vector<8x96xf32>
    %248 = vector.extract_strided_slice %247 {offsets = [0, 0], sizes = [8, 32], strides = [1, 1]} : vector<8x96xf32> to vector<8x32xf32>
    %249 = vector.extract_strided_slice %247 {offsets = [0, 32], sizes = [8, 32], strides = [1, 1]} : vector<8x96xf32> to vector<8x32xf32>
    %250 = vector.extract_strided_slice %247 {offsets = [0, 64], sizes = [8, 32], strides = [1, 1]} : vector<8x96xf32> to vector<8x32xf32>
    %251 = vector.extract_strided_slice %241 {offsets = [0, 96], sizes = [8, 32], strides = [1, 1]} : vector<8x128xf32> to vector<8x32xf32>
    %252 = math.tanh %251 : vector<8x32xf32>
    %253 = arith.mulf %249, %233 : vector<8x32xf32>
    %254 = arith.mulf %248, %252 : vector<8x32xf32>
    %255 = arith.addf %253, %254 : vector<8x32xf32>
    %256 = math.tanh %255 : vector<8x32xf32>
    %257 = arith.mulf %250, %256 : vector<8x32xf32>
    %c2_i32_73 = arith.constant 2 : i32
    %c8_i32_74 = arith.constant 8 : i32
    %258 = arith.muli %c2_i32_73, %c8_i32_74 : i32
    %259 = tpu.assume_multiple %258, 8 : i32
    %260 = arith.index_cast %259 : i32 to index
    %c0_75 = arith.constant 0 : index
    %261 = vector.load %arg12[%260, %c0_75] : memref<64x128xf32, #tpu.memory_space<vmem>>, vector<8x128xf32>
    %cst_76 = arith.constant dense<0.000000e+00> : vector<8x128xf32>
    %262 = tpu.matmul %257, %205, %cst_76 {dimension_numbers = #tpu.dot_dimension_numbers<[1], [0], [0], [1], [0, 0, 1, 1], [], []>} : vector<8x32xf32>, vector<32x128xf32>, vector<8x128xf32> -> vector<8x128xf32>
    %263 = arith.addf %261, %262 : vector<8x128xf32>
    %264 = vector.extract_strided_slice %263 {offsets = [0, 0], sizes = [8, 96], strides = [1, 1]} : vector<8x128xf32> to vector<8x96xf32>
    %265 = arith.negf %264 : vector<8x96xf32>
    %266 = math.exp %265 : vector<8x96xf32>
    %cst_77 = arith.constant 1.000000e+00 : f32
    %267 = vector.broadcast %cst_77 : f32 to vector<8x96xf32>
    %268 = arith.addf %267, %266 : vector<8x96xf32>
    %269 = arith.divf %267, %268 : vector<8x96xf32>
    %270 = vector.extract_strided_slice %269 {offsets = [0, 0], sizes = [8, 32], strides = [1, 1]} : vector<8x96xf32> to vector<8x32xf32>
    %271 = vector.extract_strided_slice %269 {offsets = [0, 32], sizes = [8, 32], strides = [1, 1]} : vector<8x96xf32> to vector<8x32xf32>
    %272 = vector.extract_strided_slice %269 {offsets = [0, 64], sizes = [8, 32], strides = [1, 1]} : vector<8x96xf32> to vector<8x32xf32>
    %273 = vector.extract_strided_slice %263 {offsets = [0, 96], sizes = [8, 32], strides = [1, 1]} : vector<8x128xf32> to vector<8x32xf32>
    %274 = math.tanh %273 : vector<8x32xf32>
    %275 = arith.mulf %271, %255 : vector<8x32xf32>
    %276 = arith.mulf %270, %274 : vector<8x32xf32>
    %277 = arith.addf %275, %276 : vector<8x32xf32>
    %278 = math.tanh %277 : vector<8x32xf32>
    %279 = arith.mulf %272, %278 : vector<8x32xf32>
    %c3_i32_78 = arith.constant 3 : i32
    %c8_i32_79 = arith.constant 8 : i32
    %280 = arith.muli %c3_i32_78, %c8_i32_79 : i32
    %281 = tpu.assume_multiple %280, 8 : i32
    %282 = arith.index_cast %281 : i32 to index
    %c0_80 = arith.constant 0 : index
    %283 = vector.load %arg12[%282, %c0_80] : memref<64x128xf32, #tpu.memory_space<vmem>>, vector<8x128xf32>
    %cst_81 = arith.constant dense<0.000000e+00> : vector<8x128xf32>
    %284 = tpu.matmul %279, %205, %cst_81 {dimension_numbers = #tpu.dot_dimension_numbers<[1], [0], [0], [1], [0, 0, 1, 1], [], []>} : vector<8x32xf32>, vector<32x128xf32>, vector<8x128xf32> -> vector<8x128xf32>
    %285 = arith.addf %283, %284 : vector<8x128xf32>
    %286 = vector.extract_strided_slice %285 {offsets = [0, 0], sizes = [8, 96], strides = [1, 1]} : vector<8x128xf32> to vector<8x96xf32>
    %287 = arith.negf %286 : vector<8x96xf32>
    %288 = math.exp %287 : vector<8x96xf32>
    %cst_82 = arith.constant 1.000000e+00 : f32
    %289 = vector.broadcast %cst_82 : f32 to vector<8x96xf32>
    %290 = arith.addf %289, %288 : vector<8x96xf32>
    %291 = arith.divf %289, %290 : vector<8x96xf32>
    %292 = vector.extract_strided_slice %291 {offsets = [0, 0], sizes = [8, 32], strides = [1, 1]} : vector<8x96xf32> to vector<8x32xf32>
    %293 = vector.extract_strided_slice %291 {offsets = [0, 32], sizes = [8, 32], strides = [1, 1]} : vector<8x96xf32> to vector<8x32xf32>
    %294 = vector.extract_strided_slice %291 {offsets = [0, 64], sizes = [8, 32], strides = [1, 1]} : vector<8x96xf32> to vector<8x32xf32>
    %295 = vector.extract_strided_slice %285 {offsets = [0, 96], sizes = [8, 32], strides = [1, 1]} : vector<8x128xf32> to vector<8x32xf32>
    %296 = math.tanh %295 : vector<8x32xf32>
    %297 = arith.mulf %293, %277 : vector<8x32xf32>
    %298 = arith.mulf %292, %296 : vector<8x32xf32>
    %299 = arith.addf %297, %298 : vector<8x32xf32>
    %300 = math.tanh %299 : vector<8x32xf32>
    %301 = arith.mulf %294, %300 : vector<8x32xf32>
    %c4_i32_83 = arith.constant 4 : i32
    %c8_i32_84 = arith.constant 8 : i32
    %302 = arith.muli %c4_i32_83, %c8_i32_84 : i32
    %303 = tpu.assume_multiple %302, 8 : i32
    %304 = arith.index_cast %303 : i32 to index
    %c0_85 = arith.constant 0 : index
    %305 = vector.load %arg12[%304, %c0_85] : memref<64x128xf32, #tpu.memory_space<vmem>>, vector<8x128xf32>
    %cst_86 = arith.constant dense<0.000000e+00> : vector<8x128xf32>
    %306 = tpu.matmul %301, %205, %cst_86 {dimension_numbers = #tpu.dot_dimension_numbers<[1], [0], [0], [1], [0, 0, 1, 1], [], []>} : vector<8x32xf32>, vector<32x128xf32>, vector<8x128xf32> -> vector<8x128xf32>
    %307 = arith.addf %305, %306 : vector<8x128xf32>
    %308 = vector.extract_strided_slice %307 {offsets = [0, 0], sizes = [8, 96], strides = [1, 1]} : vector<8x128xf32> to vector<8x96xf32>
    %309 = arith.negf %308 : vector<8x96xf32>
    %310 = math.exp %309 : vector<8x96xf32>
    %cst_87 = arith.constant 1.000000e+00 : f32
    %311 = vector.broadcast %cst_87 : f32 to vector<8x96xf32>
    %312 = arith.addf %311, %310 : vector<8x96xf32>
    %313 = arith.divf %311, %312 : vector<8x96xf32>
    %314 = vector.extract_strided_slice %313 {offsets = [0, 0], sizes = [8, 32], strides = [1, 1]} : vector<8x96xf32> to vector<8x32xf32>
    %315 = vector.extract_strided_slice %313 {offsets = [0, 32], sizes = [8, 32], strides = [1, 1]} : vector<8x96xf32> to vector<8x32xf32>
    %316 = vector.extract_strided_slice %313 {offsets = [0, 64], sizes = [8, 32], strides = [1, 1]} : vector<8x96xf32> to vector<8x32xf32>
    %317 = vector.extract_strided_slice %307 {offsets = [0, 96], sizes = [8, 32], strides = [1, 1]} : vector<8x128xf32> to vector<8x32xf32>
    %318 = math.tanh %317 : vector<8x32xf32>
    %319 = arith.mulf %315, %299 : vector<8x32xf32>
    %320 = arith.mulf %314, %318 : vector<8x32xf32>
    %321 = arith.addf %319, %320 : vector<8x32xf32>
    %322 = math.tanh %321 : vector<8x32xf32>
    %323 = arith.mulf %316, %322 : vector<8x32xf32>
    %c5_i32_88 = arith.constant 5 : i32
    %c8_i32_89 = arith.constant 8 : i32
    %324 = arith.muli %c5_i32_88, %c8_i32_89 : i32
    %325 = tpu.assume_multiple %324, 8 : i32
    %326 = arith.index_cast %325 : i32 to index
    %c0_90 = arith.constant 0 : index
    %327 = vector.load %arg12[%326, %c0_90] : memref<64x128xf32, #tpu.memory_space<vmem>>, vector<8x128xf32>
    %cst_91 = arith.constant dense<0.000000e+00> : vector<8x128xf32>
    %328 = tpu.matmul %323, %205, %cst_91 {dimension_numbers = #tpu.dot_dimension_numbers<[1], [0], [0], [1], [0, 0, 1, 1], [], []>} : vector<8x32xf32>, vector<32x128xf32>, vector<8x128xf32> -> vector<8x128xf32>
    %329 = arith.addf %327, %328 : vector<8x128xf32>
    %330 = vector.extract_strided_slice %329 {offsets = [0, 0], sizes = [8, 96], strides = [1, 1]} : vector<8x128xf32> to vector<8x96xf32>
    %331 = arith.negf %330 : vector<8x96xf32>
    %332 = math.exp %331 : vector<8x96xf32>
    %cst_92 = arith.constant 1.000000e+00 : f32
    %333 = vector.broadcast %cst_92 : f32 to vector<8x96xf32>
    %334 = arith.addf %333, %332 : vector<8x96xf32>
    %335 = arith.divf %333, %334 : vector<8x96xf32>
    %336 = vector.extract_strided_slice %335 {offsets = [0, 0], sizes = [8, 32], strides = [1, 1]} : vector<8x96xf32> to vector<8x32xf32>
    %337 = vector.extract_strided_slice %335 {offsets = [0, 32], sizes = [8, 32], strides = [1, 1]} : vector<8x96xf32> to vector<8x32xf32>
    %338 = vector.extract_strided_slice %335 {offsets = [0, 64], sizes = [8, 32], strides = [1, 1]} : vector<8x96xf32> to vector<8x32xf32>
    %339 = vector.extract_strided_slice %329 {offsets = [0, 96], sizes = [8, 32], strides = [1, 1]} : vector<8x128xf32> to vector<8x32xf32>
    %340 = math.tanh %339 : vector<8x32xf32>
    %341 = arith.mulf %337, %321 : vector<8x32xf32>
    %342 = arith.mulf %336, %340 : vector<8x32xf32>
    %343 = arith.addf %341, %342 : vector<8x32xf32>
    %344 = math.tanh %343 : vector<8x32xf32>
    %345 = arith.mulf %338, %344 : vector<8x32xf32>
    %c6_i32_93 = arith.constant 6 : i32
    %c8_i32_94 = arith.constant 8 : i32
    %346 = arith.muli %c6_i32_93, %c8_i32_94 : i32
    %347 = tpu.assume_multiple %346, 8 : i32
    %348 = arith.index_cast %347 : i32 to index
    %c0_95 = arith.constant 0 : index
    %349 = vector.load %arg12[%348, %c0_95] : memref<64x128xf32, #tpu.memory_space<vmem>>, vector<8x128xf32>
    %cst_96 = arith.constant dense<0.000000e+00> : vector<8x128xf32>
    %350 = tpu.matmul %345, %205, %cst_96 {dimension_numbers = #tpu.dot_dimension_numbers<[1], [0], [0], [1], [0, 0, 1, 1], [], []>} : vector<8x32xf32>, vector<32x128xf32>, vector<8x128xf32> -> vector<8x128xf32>
    %351 = arith.addf %349, %350 : vector<8x128xf32>
    %352 = vector.extract_strided_slice %351 {offsets = [0, 0], sizes = [8, 96], strides = [1, 1]} : vector<8x128xf32> to vector<8x96xf32>
    %353 = arith.negf %352 : vector<8x96xf32>
    %354 = math.exp %353 : vector<8x96xf32>
    %cst_97 = arith.constant 1.000000e+00 : f32
    %355 = vector.broadcast %cst_97 : f32 to vector<8x96xf32>
    %356 = arith.addf %355, %354 : vector<8x96xf32>
    %357 = arith.divf %355, %356 : vector<8x96xf32>
    %358 = vector.extract_strided_slice %357 {offsets = [0, 0], sizes = [8, 32], strides = [1, 1]} : vector<8x96xf32> to vector<8x32xf32>
    %359 = vector.extract_strided_slice %357 {offsets = [0, 32], sizes = [8, 32], strides = [1, 1]} : vector<8x96xf32> to vector<8x32xf32>
    %360 = vector.extract_strided_slice %357 {offsets = [0, 64], sizes = [8, 32], strides = [1, 1]} : vector<8x96xf32> to vector<8x32xf32>
    %361 = vector.extract_strided_slice %351 {offsets = [0, 96], sizes = [8, 32], strides = [1, 1]} : vector<8x128xf32> to vector<8x32xf32>
    %362 = math.tanh %361 : vector<8x32xf32>
    %363 = arith.mulf %359, %343 : vector<8x32xf32>
    %364 = arith.mulf %358, %362 : vector<8x32xf32>
    %365 = arith.addf %363, %364 : vector<8x32xf32>
    %366 = math.tanh %365 : vector<8x32xf32>
    %367 = arith.mulf %360, %366 : vector<8x32xf32>
    %c7_i32_98 = arith.constant 7 : i32
    %c8_i32_99 = arith.constant 8 : i32
    %368 = arith.muli %c7_i32_98, %c8_i32_99 : i32
    %369 = tpu.assume_multiple %368, 8 : i32
    %370 = arith.index_cast %369 : i32 to index
    %c0_100 = arith.constant 0 : index
    %371 = vector.load %arg12[%370, %c0_100] : memref<64x128xf32, #tpu.memory_space<vmem>>, vector<8x128xf32>
    %cst_101 = arith.constant dense<0.000000e+00> : vector<8x128xf32>
    %372 = tpu.matmul %367, %205, %cst_101 {dimension_numbers = #tpu.dot_dimension_numbers<[1], [0], [0], [1], [0, 0, 1, 1], [], []>} : vector<8x32xf32>, vector<32x128xf32>, vector<8x128xf32> -> vector<8x128xf32>
    %373 = arith.addf %371, %372 : vector<8x128xf32>
    %374 = vector.extract_strided_slice %373 {offsets = [0, 0], sizes = [8, 96], strides = [1, 1]} : vector<8x128xf32> to vector<8x96xf32>
    %375 = arith.negf %374 : vector<8x96xf32>
    %376 = math.exp %375 : vector<8x96xf32>
    %cst_102 = arith.constant 1.000000e+00 : f32
    %377 = vector.broadcast %cst_102 : f32 to vector<8x96xf32>
    %378 = arith.addf %377, %376 : vector<8x96xf32>
    %379 = arith.divf %377, %378 : vector<8x96xf32>
    %380 = vector.extract_strided_slice %379 {offsets = [0, 0], sizes = [8, 32], strides = [1, 1]} : vector<8x96xf32> to vector<8x32xf32>
    %381 = vector.extract_strided_slice %379 {offsets = [0, 32], sizes = [8, 32], strides = [1, 1]} : vector<8x96xf32> to vector<8x32xf32>
    %382 = vector.extract_strided_slice %379 {offsets = [0, 64], sizes = [8, 32], strides = [1, 1]} : vector<8x96xf32> to vector<8x32xf32>
    %383 = vector.extract_strided_slice %373 {offsets = [0, 96], sizes = [8, 32], strides = [1, 1]} : vector<8x128xf32> to vector<8x32xf32>
    %384 = math.tanh %383 : vector<8x32xf32>
    %385 = arith.mulf %381, %365 : vector<8x32xf32>
    %386 = arith.mulf %380, %384 : vector<8x32xf32>
    %387 = arith.addf %385, %386 : vector<8x32xf32>
    %388 = math.tanh %387 : vector<8x32xf32>
    %389 = arith.mulf %382, %388 : vector<8x32xf32>
    %c8_i32_103 = arith.constant 8 : i32
    %c0_104 = arith.constant 0 : index
    %c0_105 = arith.constant 0 : index
    %390 = vector.load %arg8[%c0_104, %c0_105] : memref<32x4xf32, #tpu.memory_space<vmem>>, vector<32x4xf32>
    %cst_106 = arith.constant dense<0.000000e+00> : vector<8x4xf32>
    %391 = tpu.matmul %389, %390, %cst_106 {dimension_numbers = #tpu.dot_dimension_numbers<[1], [0], [0], [1], [0, 0, 1, 1], [], []>} : vector<8x32xf32>, vector<32x4xf32>, vector<8x4xf32> -> vector<8x4xf32>
    %c0_107 = arith.constant 0 : index
    %c0_108 = arith.constant 0 : index
    %392 = vector.load %arg9[%c0_107, %c0_108] : memref<1x4xf32, #tpu.memory_space<vmem>>, vector<1x4xf32>
    %393 = vector.broadcast %392 : vector<1x4xf32> to vector<8x4xf32>
    %394 = arith.addf %391, %393 : vector<8x4xf32>
    %395 = vector.extract_strided_slice %394 {offsets = [0, 0], sizes = [2, 4], strides = [1, 1]} : vector<8x4xf32> to vector<2x4xf32>
    %c0_109 = arith.constant 0 : index
    %c0_110 = arith.constant 0 : index
    %396 = vector.load %arg10[%c0_109, %c0_110] : memref<2x4xf32, #tpu.memory_space<vmem>>, vector<2x4xf32>
    tpu.vector_store %arg10[%c0_109, %c0_110], %395 {strides = array<i32>} : memref<2x4xf32, #tpu.memory_space<vmem>>, vector<2x4xf32>,
    return
  }
  func.func @transform_0(%arg0: i32) -> (i32, i32) {
    %c0_i32 = arith.constant 0 : i32
    %c0_i32_0 = arith.constant 0 : i32
    %c0_i32_1 = arith.constant 0 : i32
    return %c0_i32, %c0_i32_0 : i32, i32
  }
  func.func @transform_1(%arg0: i32) -> (i32, i32) {
    %c0_i32 = arith.constant 0 : i32
    %c0_i32_0 = arith.constant 0 : i32
    %c0_i32_1 = arith.constant 0 : i32
    return %c0_i32, %c0_i32_0 : i32, i32
  }
  func.func @transform_2(%arg0: i32) -> (i32, i32) {
    %c0_i32 = arith.constant 0 : i32
    %c0_i32_0 = arith.constant 0 : i32
    %c0_i32_1 = arith.constant 0 : i32
    return %c0_i32, %c0_i32_0 : i32, i32
  }
  func.func @transform_3(%arg0: i32) -> (i32, i32) {
    %c0_i32 = arith.constant 0 : i32
    %c0_i32_0 = arith.constant 0 : i32
    %c0_i32_1 = arith.constant 0 : i32
    return %c0_i32, %c0_i32_0 : i32, i32
  }
  func.func @transform_4(%arg0: i32) -> (i32, i32) {
    %c0_i32 = arith.constant 0 : i32
    %c0_i32_0 = arith.constant 0 : i32
    %c0_i32_1 = arith.constant 0 : i32
    return %c0_i32, %c0_i32_0 : i32, i32
  }
  func.func @transform_5(%arg0: i32) -> (i32, i32) {
    %c0_i32 = arith.constant 0 : i32
    %c0_i32_0 = arith.constant 0 : i32
    %c0_i32_1 = arith.constant 0 : i32
    return %c0_i32, %c0_i32_0 : i32, i32
  }
  func.func @transform_6(%arg0: i32) -> (i32, i32) {
    %c0_i32 = arith.constant 0 : i32
    %c0_i32_0 = arith.constant 0 : i32
    %c0_i32_1 = arith.constant 0 : i32
    return %c0_i32, %c0_i32_0 : i32, i32
  }
  func.func @transform_7(%arg0: i32) -> (i32, i32) {
    %c0_i32 = arith.constant 0 : i32
    %c0_i32_0 = arith.constant 0 : i32
    %c0_i32_1 = arith.constant 0 : i32
    return %c0_i32, %c0_i32_0 : i32, i32
  }
  func.func @transform_8(%arg0: i32) -> (i32, i32) {
    %c0_i32 = arith.constant 0 : i32
    %c0_i32_0 = arith.constant 0 : i32
    %c0_i32_1 = arith.constant 0 : i32
    return %c0_i32, %c0_i32_0 : i32, i32
  }
  func.func @transform_9(%arg0: i32) -> (i32, i32) {
    %c0_i32 = arith.constant 0 : i32
    %c0_i32_0 = arith.constant 0 : i32
    %c0_i32_1 = arith.constant 0 : i32
    return %c0_i32, %c0_i32_0 : i32, i32
  }
}

</mosaic_0001>

<bundles_post_ra>
// kernel: tpu_custom_call.1
= control target key start
LH: loop header
LB: loop body
LE: loop exit
PB: predicated region body
PF: predicated region fallthrough
CT: control target
= control target key end

     0   :  { %v2533_v1 = vmov 0.0   ;;  %vm2534_vm0 = vmmov 0   ;;  %v2535_v4 = vmov 0   ;;  %s3008_s0 = inlined_call_operand.vmem [shape: f32[64,1], index: 0, kind: input, shape index: {}]   ;;  %s3009_s1 = inlined_call_operand.vmem [shape: f32[1,128], index: 1, kind: input, shape index: {}]   ;;  %s3010_s2 = inlined_call_operand.vmem [shape: f32[32,128], index: 2, kind: input, shape index: {}]   ;;  %s3011_s3 = inlined_call_operand.vmem [shape: f32[1,128], index: 3, kind: input, shape index: {}]   ;;  %s3012_s4 = inlined_call_operand.vmem [shape: f32[32,128], index: 4, kind: input, shape index: {}]   ;;  %s3013_s5 = inlined_call_operand.vmem [shape: f32[32,128], index: 5, kind: input, shape index: {}]   ;;  %s3014_s6 = inlined_call_operand.vmem [shape: f32[1,128], index: 6, kind: input, shape index: {}]   ;;  %s3015_s7 = inlined_call_operand.vmem [shape: f32[32,4], index: 7, kind: input, shape index: {}]   ;;  %s3016_s8 = inlined_call_operand.vmem [shape: f32[1,4], index: 8, kind: input, shape index: {}]   ;;  %s3017_s9 = inlined_call_operand.hbm [shape: f32[2,4], index: 9, kind: output, shape index: {}]  }
   0x1   :  { %v2592_v0 = vld [vmem:[%s3010_s2 + $0x18] sm:$0xff]  ;;  %2168 = vmatprep.subr.mxu0 %v2533_v1  ;;  %v2598_v2 = vld [vmem:[%s3010_s2 + $0x10] sm:$0xff]  ;;  %2176 = vmatprep.mubr.msk.f32.mxu0 %vm2534_vm0, %v2533_v1  ;;  %v39_v3 = vld [vmem:[%s3008_s0] sm:$0xff] }
   0x2   :  { %2169 = vmatpush3.msra.mxu0 %v2592_v0  ;;  %2381 = vset.pattern.permute.xlu0 %v2535_v4 }
   0x3   :  { %14 = vsyncpa [#allocation5], 0  ;;  %2170 = vmatprep.subr.mxu0 %v2533_v1  ;;  %v2610_v5 = vld [vmem:[%s3010_s2 + $0x8] sm:$0xff]  ;;  %49 = vperm.xlu0 %2381, %v39_v3   ;;  %v2618_v6 = vld [vmem:[%s3010_s2] sm:$0xff]  ;;  %s2536_s22 = smov 32   ;;  %s2537_s23 = smov 64  }
   0x4   :  { %2171 = vmatpush3.msra.mxu0 %v2598_v2  ;;  %2179 = vmatprep.subr.mxu1 %v2533_v1  ;;  %v2648_v8 = vld [vmem:[%s3009_s1] ss:$0 sm:$0xff]  ;;  %v40_v26 = vld [vmem:[%s3008_s0 + $0x8] sm:$0xff]  ;;  %vm124_vm1 = vcmask 261120   ;;  %v41_v47 = vld [vmem:[%s3008_s0 + $0x10] sm:$0xff]  ;;  %s2538_s17 = smov [#allocation4]  }
   0x5   :  { %2172 = vmatprep.subr.mxu0 %v2533_v1  ;;  %2180 = vmatpush3.msra.mxu1 %v2592_v0  ;;  %v2654_v10 = vld [vmem:[%s3011_s3] ss:$0 sm:$0xff]  ;;  %vm2012_vm2 = vcmask 25600  }
   0x6   :  { %2173 = vmatpush3.msra.mxu0 %v2610_v5  ;;  %2181 = vmatprep.subr.mxu1 %v2533_v1 }
   0x7   :  { %2174 = vmatprep.subr.mxu0 %v2533_v1  ;;  %2182 = vmatpush3.msra.mxu1 %v2598_v2 }
   0x8   :  { %2175 = vmatpush3.msra.mxu0 %v2618_v6  ;;  %2183 = vmatprep.subr.mxu1 %v2533_v1 }
   0x9   :  { %2177 = vmatmul.mubr.f32.vlgmr.msra.gmra.mxu0 %v2533_v1  ;;  %2184 = vmatpush3.msra.mxu1 %v2610_v5 }
   0xa   :  { %2185 = vmatprep.subr.mxu1 %v2533_v1  ;;  %2187 = vmatprep.mubr.msk.f32.mxu1 %vm2534_vm0, %v2533_v1 }
   0xb   :  { %2186 = vmatpush3.msra.mxu1 %v2618_v6  ;;  %2382 = vset.pattern.permute.xlu1 %v2535_v4 }
   0xc   :  { %2190 = vmatprep.subr.mxu0 %v2533_v1  ;;  %2198 = vmatprep.mubr.msk.f32.mxu0 %vm2534_vm0, %v2533_v1 }
   0xd   :  { %2191 = vmatpush3.msra.mxu0 %v2592_v0  ;;  %2201 = vmatprep.subr.mxu1 %v2533_v1 }
   0xe   :  { %2192 = vmatprep.subr.mxu0 %v2533_v1 }
   0xf   :  { %2193 = vmatpush3.msra.mxu0 %v2598_v2 }
  0x10   :  { %2194 = vmatprep.subr.mxu0 %v2533_v1 }
  0x11   :  { %2195 = vmatpush3.msra.mxu0 %v2610_v5 }
  0x12   :  { %2196 = vmatprep.subr.mxu0 %v2533_v1 }
  0x13   :  { %2197 = vmatpush3.msra.mxu0 %v2618_v6 }
  0x14   :  { %2212 = vmatprep.subr.mxu0 %v2533_v1 }
  0x7e   :  { %v50_v7 = vpop.permute.xlu0 %49 }
  0x7f   :  { %v93_v9 = vmul.f32 %v2648_v8, %v50_v7 }
  0x81   :  { %v107_v11 = vadd.f32 %v2654_v10, %v93_v9 }
  0xc9   :  { %v194_v12 = vpop.f32.mrf.mxu0 }
  0xca   :  { %v198_v13 = vadd.f32 %v194_v12, %v107_v11  ;;  %v42_v11 = vld [vmem:[%s3008_s0 + $0x18] sm:$0xff] }
  0xcb   :  { %v2178_v14 = vpop.f32.mrf.mxu0 }
  0xcc   :  { %2383 = vtanh.f32 %v198_v13  ;;  %v2030_v16 = vmul.f32 -1.442695, %v198_v13 }
  0xce   :  { %2385 = vpow2.f32 %v2030_v16 }
  0xd9   :  { %v2384_v15 = vpop.eup %2383 }
  0xda   :  { %208 = vrot.lane.b32.xlu0 %v2384_v15, %s2536_s22 }
  0xdb   :  { %v2386_v17 = vpop.eup %2385 }
  0xdc   :  { %v202_v18 = vadd.f32 1.0, %v2386_v17 }
  0xde   :  { %2387 = vrcp.f32 %v202_v18 }
  0xeb   :  { %v2388_v19 = vpop.eup %2387 }
  0xec   :  { %v206_v22 = vmul.f32 0.0, %v2388_v19 }
 0x14c   :  { %v209_v20 = vpop.permute.xlu0 %208 }
 0x14d   :  { %v211_v21 = vmul.f32 %v2388_v19, %v209_v20 }
 0x14f   :  { %213 = vrot.lane.b32.xlu1 %v211_v21, %s2536_s22 }
 0x1c1   :  { %v214_v23 = vpop.permute.xlu1 %213 }
 0x1c2   :  { %v216_v24 = vadd.f32 %v214_v23, %v206_v22 }
 0x1c4   :  { %2389 = vtanh.f32 %v216_v24 }
 0x1d1   :  { %v2390_v25 = vpop.eup %2389 }
 0x1d2   :  { %219 = vrot.lane.b32.xlu1 %v2390_v25, %s2536_s22 }
 0x1d6   :  { %54 = vperm.xlu1 %2382, %v40_v26  }
 0x244   :  { %v220_v27 = vpop.permute.xlu1 %219 }
 0x245   :  { %v222_v28 = vmul.f32 %v2388_v19, %v220_v27 }
 0x247   :  { %224 = vrot.lane.b32.xlu0 %v222_v28, %s2537_s23 }
 0x251   :  { %v55_v30 = vpop.permute.xlu1 %54 }
 0x252   :  { %v94_v31 = vmul.f32 %v2648_v8, %v55_v30 }
 0x254   :  { %v108_v32 = vadd.f32 %v2654_v10, %v94_v31 }
 0x2b9   :  { %v225_v29 = vpop.permute.xlu0 %224 }
 0x2ba   :  { %227 = vst.msk [vmem:[#allocation2] sm:$0xff] %vm124_vm1, %v225_v29  ;;  %2188 = vmatmul.mubr.msk.f32.vlgmr.msra.gmra.mxu1 %vm124_vm1, %v225_v29 }
 0x2bb   :  { %2202 = vmatpush3.msra.mxu1 %v2592_v0  ;;  %2209 = vmatprep.mubr.msk.f32.mxu1 %vm2534_vm0, %v2533_v1 }
 0x2bc   :  { %2203 = vmatprep.subr.mxu1 %v2533_v1 }
 0x2bd   :  { %2204 = vmatpush3.msra.mxu1 %v2598_v2 }
 0x2be   :  { %2205 = vmatprep.subr.mxu1 %v2533_v1 }
 0x2bf   :  { %2206 = vmatpush3.msra.mxu1 %v2610_v5 }
 0x2c0   :  { %2207 = vmatprep.subr.mxu1 %v2533_v1 }
 0x2c1   :  { %2208 = vmatpush3.msra.mxu1 %v2618_v6 }
 0x2c2   :  { %2223 = vmatprep.subr.mxu1 %v2533_v1 }
 0x37a   :  { %v298_v33 = vpop.f32.mrf.mxu1 }
 0x37b   :  { %v302_v34 = vadd.f32 %v298_v33, %v108_v32  ;;  %v43_v32 = vld [vmem:[%s3008_s0 + $0x20] sm:$0xff] }
 0x37c   :  { %v2189_v35 = vpop.f32.mrf.mxu1 }
 0x37d   :  { %2391 = vtanh.f32 %v302_v34  ;;  %v2032_v37 = vmul.f32 -1.442695, %v302_v34 }
 0x37f   :  { %2393 = vpow2.f32 %v2032_v37 }
 0x38a   :  { %v2392_v36 = vpop.eup %2391 }
 0x38b   :  { %312 = vrot.lane.b32.xlu0 %v2392_v36, %s2536_s22 }
 0x38c   :  { %v2394_v38 = vpop.eup %2393 }
 0x38d   :  { %v306_v39 = vadd.f32 1.0, %v2394_v38 }
 0x38f   :  { %2395 = vrcp.f32 %v306_v39 }
 0x39c   :  { %v2396_v40 = vpop.eup %2395 }
 0x39d   :  { %v310_v43 = vmul.f32 %v2396_v40, %v216_v24 }
 0x3fd   :  { %v313_v41 = vpop.permute.xlu0 %312 }
 0x3fe   :  { %v315_v42 = vmul.f32 %v2396_v40, %v313_v41 }
 0x400   :  { %317 = vrot.lane.b32.xlu1 %v315_v42, %s2536_s22 }
 0x472   :  { %v318_v44 = vpop.permute.xlu1 %317 }
 0x473   :  { %v320_v45 = vadd.f32 %v318_v44, %v310_v43 }
 0x475   :  { %2397 = vtanh.f32 %v320_v45 }
 0x482   :  { %v2398_v46 = vpop.eup %2397 }
 0x483   :  { %323 = vrot.lane.b32.xlu0 %v2398_v46, %s2536_s22 }
 0x487   :  { %59 = vperm.xlu0 %2381, %v41_v47  }
 0x4f5   :  { %v324_v48 = vpop.permute.xlu0 %323 }
 0x4f6   :  { %v326_v49 = vmul.f32 %v2396_v40, %v324_v48 }
 0x4f8   :  { %328 = vrot.lane.b32.xlu1 %v326_v49, %s2537_s23 }
 0x502   :  { %v60_v51 = vpop.permute.xlu0 %59 }
 0x503   :  { %v95_v52 = vmul.f32 %v2648_v8, %v60_v51 }
 0x505   :  { %v109_v53 = vadd.f32 %v2654_v10, %v95_v52 }
 0x56a   :  { %v329_v50 = vpop.permute.xlu1 %328 }
 0x56b   :  { %332 = vst.msk [vmem:[#allocation2 + $0x8] sm:$0xff] %vm124_vm1, %v329_v50  ;;  %2199 = vmatmul.mubr.msk.f32.vlgmr.msra.gmra.mxu0 %vm124_vm1, %v329_v50 }
 0x56c   :  { %2213 = vmatpush3.msra.mxu0 %v2592_v0  ;;  %2220 = vmatprep.mubr.msk.f32.mxu0 %vm2534_vm0, %v2533_v1 }
 0x56d   :  { %2214 = vmatprep.subr.mxu0 %v2533_v1 }
 0x56e   :  { %2215 = vmatpush3.msra.mxu0 %v2598_v2 }
 0x56f   :  { %2216 = vmatprep.subr.mxu0 %v2533_v1 }
 0x570   :  { %2217 = vmatpush3.msra.mxu0 %v2610_v5 }
 0x571   :  { %2218 = vmatprep.subr.mxu0 %v2533_v1 }
 0x572   :  { %2219 = vmatpush3.msra.mxu0 %v2618_v6 }
 0x573   :  { %2234 = vmatprep.subr.mxu0 %v2533_v1 }
 0x62b   :  { %v403_v54 = vpop.f32.mrf.mxu0 }
 0x62c   :  { %v407_v55 = vadd.f32 %v403_v54, %v109_v53  ;;  %v44_v53 = vld [vmem:[%s3008_s0 + $0x28] sm:$0xff] }
 0x62d   :  { %v2200_v56 = vpop.f32.mrf.mxu0 }
 0x62e   :  { %2399 = vtanh.f32 %v407_v55  ;;  %v2034_v58 = vmul.f32 -1.442695, %v407_v55 }
 0x630   :  { %2401 = vpow2.f32 %v2034_v58 }
 0x63b   :  { %v2400_v57 = vpop.eup %2399 }
 0x63c   :  { %417 = vrot.lane.b32.xlu1 %v2400_v57, %s2536_s22 }
 0x63d   :  { %v2402_v59 = vpop.eup %2401 }
 0x63e   :  { %v411_v60 = vadd.f32 1.0, %v2402_v59 }
 0x640   :  { %2403 = vrcp.f32 %v411_v60 }
 0x64d   :  { %v2404_v61 = vpop.eup %2403 }
 0x64e   :  { %v415_v3 = vmul.f32 %v2404_v61, %v320_v45 }
 0x6ae   :  { %v418_v62 = vpop.permute.xlu1 %417 }
 0x6af   :  { %v420_v63 = vmul.f32 %v2404_v61, %v418_v62 }
 0x6b1   :  { %422 = vrot.lane.b32.xlu0 %v420_v63, %s2536_s22 }
 0x723   :  { %v423_v4 = vpop.permute.xlu0 %422 }
 0x724   :  { %v425_v7 = vadd.f32 %v423_v4, %v415_v3 }
 0x726   :  { %2405 = vtanh.f32 %v425_v7 }
 0x733   :  { %v2406_v9 = vpop.eup %2405 }
 0x734   :  { %428 = vrot.lane.b32.xlu1 %v2406_v9, %s2536_s22 }
 0x738   :  { %64 = vperm.xlu1 %2382, %v42_v11  }
 0x7a6   :  { %v429_v12 = vpop.permute.xlu1 %428 }
 0x7a7   :  { %v431_v13 = vmul.f32 %v2404_v61, %v429_v12 }
 0x7a9   :  { %433 = vrot.lane.b32.xlu0 %v431_v13, %s2537_s23  ;;  %v966_v13 = vld [vmem:[%s3012_s4 + $0x18] sm:$0xff] }
 0x7b3   :  { %v65_v15 = vpop.permute.xlu1 %64 }
 0x7b4   :  { %v96_v16 = vmul.f32 %v2648_v8, %v65_v15 }
 0x7b6   :  { %v110_v17 = vadd.f32 %v2654_v10, %v96_v16 }
 0x81b   :  { %v434_v14 = vpop.permute.xlu0 %433 }
 0x81c   :  { %437 = vst.msk [vmem:[#allocation2 + $0x10] sm:$0xff] %vm124_vm1, %v434_v14  ;;  %2210 = vmatmul.mubr.msk.f32.vlgmr.msra.gmra.mxu1 %vm124_vm1, %v434_v14  ;;  %v45_v14 = vld [vmem:[%s3008_s0 + $0x30] sm:$0xff] }
 0x81d   :  { %2224 = vmatpush3.msra.mxu1 %v2592_v0  ;;  %2231 = vmatprep.mubr.msk.f32.mxu1 %vm2534_vm0, %v2533_v1 }
 0x81e   :  { %2225 = vmatprep.subr.mxu1 %v2533_v1 }
 0x81f   :  { %2226 = vmatpush3.msra.mxu1 %v2598_v2 }
 0x820   :  { %2227 = vmatprep.subr.mxu1 %v2533_v1 }
 0x821   :  { %2228 = vmatpush3.msra.mxu1 %v2610_v5 }
 0x822   :  { %2229 = vmatprep.subr.mxu1 %v2533_v1 }
 0x823   :  { %2230 = vmatpush3.msra.mxu1 %v2618_v6 }
 0x824   :  { %2245 = vmatprep.subr.mxu1 %v2533_v1 }
 0x8dc   :  { %v508_v18 = vpop.f32.mrf.mxu1 }
 0x8dd   :  { %v512_v19 = vadd.f32 %v508_v18, %v110_v17  ;;  %v965_v18 = vld [vmem:[%s3012_s4 + $0x10] sm:$0xff] }
 0x8de   :  { %v2211_v20 = vpop.f32.mrf.mxu1 }
 0x8df   :  { %2407 = vtanh.f32 %v512_v19  ;;  %v2036_v22 = vmul.f32 -1.442695, %v512_v19  ;;  %v972_v19 = vld [vmem:[#allocation2] sm:$0xff]  ;;  %v964_v20 = vld [vmem:[%s3012_s4 + $0x8] sm:$0xff] }
 0x8e1   :  { %2409 = vpow2.f32 %v2036_v22  ;;  %v973_v22 = vld [vmem:[#allocation2 + $0x8] sm:$0xff] }
 0x8ec   :  { %v2408_v21 = vpop.eup %2407 }
 0x8ed   :  { %522 = vrot.lane.b32.xlu0 %v2408_v21, %s2536_s22  ;;  %v963_v21 = vld [vmem:[%s3012_s4] sm:$0xff] }
 0x8ee   :  { %v2410_v23 = vpop.eup %2409 }
 0x8ef   :  { %v516_v24 = vadd.f32 1.0, %v2410_v23  ;;  %v974_v23 = vld [vmem:[#allocation2 + $0x10] sm:$0xff] }
 0x8f1   :  { %2411 = vrcp.f32 %v516_v24 }
 0x8fe   :  { %v2412_v25 = vpop.eup %2411 }
 0x8ff   :  { %v520_v28 = vmul.f32 %v2412_v25, %v425_v7 }
 0x95f   :  { %v523_v26 = vpop.permute.xlu0 %522 }
 0x960   :  { %v525_v27 = vmul.f32 %v2412_v25, %v523_v26 }
 0x962   :  { %527 = vrot.lane.b32.xlu1 %v525_v27, %s2536_s22 }
 0x9d4   :  { %v528_v29 = vpop.permute.xlu1 %527 }
 0x9d5   :  { %v530_v30 = vadd.f32 %v528_v29, %v520_v28 }
 0x9d7   :  { %2413 = vtanh.f32 %v530_v30 }
 0x9e4   :  { %v2414_v31 = vpop.eup %2413 }
 0x9e5   :  { %533 = vrot.lane.b32.xlu0 %v2414_v31, %s2536_s22 }
 0x9e9   :  { %69 = vperm.xlu0 %2381, %v43_v32  }
 0xa57   :  { %v534_v33 = vpop.permute.xlu0 %533 }
 0xa58   :  { %v536_v34 = vmul.f32 %v2412_v25, %v534_v33 }
 0xa5a   :  { %538 = vrot.lane.b32.xlu1 %v536_v34, %s2537_s23 }
 0xa64   :  { %v70_v36 = vpop.permute.xlu0 %69 }
 0xa65   :  { %v97_v37 = vmul.f32 %v2648_v8, %v70_v36 }
 0xa67   :  { %v111_v38 = vadd.f32 %v2654_v10, %v97_v37 }
 0xacc   :  { %v539_v35 = vpop.permute.xlu1 %538 }
 0xacd   :  { %542 = vst.msk [vmem:[#allocation2 + $0x18] sm:$0xff] %vm124_vm1, %v539_v35  ;;  %2221 = vmatmul.mubr.msk.f32.vlgmr.msra.gmra.mxu0 %vm124_vm1, %v539_v35 }
 0xace   :  { %2235 = vmatpush3.msra.mxu0 %v2592_v0  ;;  %2242 = vmatprep.mubr.msk.f32.mxu0 %vm2534_vm0, %v2533_v1 }
 0xacf   :  { %2236 = vmatprep.subr.mxu0 %v2533_v1 }
 0xad0   :  { %2237 = vmatpush3.msra.mxu0 %v2598_v2 }
 0xad1   :  { %2238 = vmatprep.subr.mxu0 %v2533_v1 }
 0xad2   :  { %2239 = vmatpush3.msra.mxu0 %v2610_v5 }
 0xad3   :  { %2240 = vmatprep.subr.mxu0 %v2533_v1 }
 0xad4   :  { %2241 = vmatpush3.msra.mxu0 %v2618_v6  ;;  %v975_v24 = vld [vmem:[#allocation2 + $0x18] sm:$0xff] }
 0xad5   :  { %2256 = vmatprep.subr.mxu0 %v966_v13 }
 0xb8d   :  { %v613_v39 = vpop.f32.mrf.mxu0 }
 0xb8e   :  { %v617_v40 = vadd.f32 %v613_v39, %v111_v38 }
 0xb8f   :  { %v2222_v41 = vpop.f32.mrf.mxu0 }
 0xb90   :  { %2415 = vtanh.f32 %v617_v40  ;;  %v2038_v43 = vmul.f32 -1.442695, %v617_v40 }
 0xb92   :  { %2417 = vpow2.f32 %v2038_v43 }
 0xb9d   :  { %v2416_v42 = vpop.eup %2415 }
 0xb9e   :  { %627 = vrot.lane.b32.xlu1 %v2416_v42, %s2536_s22 }
 0xb9f   :  { %v2418_v44 = vpop.eup %2417 }
 0xba0   :  { %v621_v45 = vadd.f32 1.0, %v2418_v44  ;;  %v2800_v44 = vld [vmem:[%s3013_s5 + $0x18] sm:$0xff] }
 0xba2   :  { %2419 = vrcp.f32 %v621_v45  ;;  %v2806_v45 = vld [vmem:[%s3013_s5 + $0x10] sm:$0xff] }
 0xbaf   :  { %v2420_v46 = vpop.eup %2419 }
 0xbb0   :  { %v625_v49 = vmul.f32 %v2420_v46, %v530_v30 }
 0xc10   :  { %v628_v47 = vpop.permute.xlu1 %627 }
 0xc11   :  { %v630_v48 = vmul.f32 %v2420_v46, %v628_v47  ;;  %v2820_v47 = vld [vmem:[%s3013_s5] sm:$0xff] }
 0xc13   :  { %632 = vrot.lane.b32.xlu0 %v630_v48, %s2536_s22 }
 0xc85   :  { %v633_v50 = vpop.permute.xlu0 %632 }
 0xc86   :  { %v635_v51 = vadd.f32 %v633_v50, %v625_v49 }
 0xc88   :  { %2421 = vtanh.f32 %v635_v51 }
 0xc95   :  { %v2422_v52 = vpop.eup %2421 }
 0xc96   :  { %638 = vrot.lane.b32.xlu1 %v2422_v52, %s2536_s22 }
 0xc9a   :  { %74 = vperm.xlu1 %2382, %v44_v53  }
 0xd08   :  { %v639_v54 = vpop.permute.xlu1 %638 }
 0xd09   :  { %v641_v55 = vmul.f32 %v2420_v46, %v639_v54  ;;  %v2813_v46 = vld [vmem:[%s3013_s5 + $0x8] sm:$0xff] }
 0xd0b   :  { %643 = vrot.lane.b32.xlu0 %v641_v55, %s2537_s23 }
 0xd15   :  { %v75_v57 = vpop.permute.xlu1 %74 }
 0xd7d   :  { %v644_v56 = vpop.permute.xlu0 %643 }
 0xd7e   :  { %647 = vst.msk [vmem:[#allocation2 + $0x20] sm:$0xff] %vm124_vm1, %v644_v56  ;;  %2232 = vmatmul.mubr.msk.f32.vlgmr.msra.gmra.mxu1 %vm124_vm1, %v644_v56  ;;  %v2855_v56 = vld [vmem:[%s3014_s6] ss:$0 sm:$0xff] }
 0xd7f   :  { %2246 = vmatpush3.msra.mxu1 %v2592_v0  ;;  %2253 = vmatprep.mubr.msk.f32.mxu1 %vm2534_vm0, %v2533_v1  ;;  %v98_v0 = vmul.f32 %v2648_v8, %v75_v57 }
 0xd80   :  { %2247 = vmatprep.subr.mxu1 %v2533_v1 }
 0xd81   :  { %2248 = vmatpush3.msra.mxu1 %v2598_v2  ;;  %v112_v58 = vadd.f32 %v2654_v10, %v98_v0 }
 0xd82   :  { %2249 = vmatprep.subr.mxu1 %v2533_v1 }
 0xd83   :  { %2250 = vmatpush3.msra.mxu1 %v2610_v5 }
 0xd84   :  { %2251 = vmatprep.subr.mxu1 %v2533_v1 }
 0xd85   :  { %2252 = vmatpush3.msra.mxu1 %v2618_v6  ;;  %v976_v25 = vld [vmem:[#allocation2 + $0x20] sm:$0xff] }
 0xd86   :  { %2276 = vmatprep.subr.mxu1 %v2533_v1 }
 0xe3e   :  { %v718_v59 = vpop.f32.mrf.mxu1 }
 0xe3f   :  { %v722_v60 = vadd.f32 %v718_v59, %v112_v58 }
 0xe40   :  { %v2233_v61 = vpop.f32.mrf.mxu1 }
 0xe41   :  { %2423 = vtanh.f32 %v722_v60  ;;  %v2040_v62 = vmul.f32 -1.442695, %v722_v60 }
 0xe43   :  { %2425 = vpow2.f32 %v2040_v62 }
 0xe4e   :  { %v2424_v2 = vpop.eup %2423 }
 0xe4f   :  { %732 = vrot.lane.b32.xlu0 %v2424_v2, %s2536_s22 }
 0xe50   :  { %v2426_v5 = vpop.eup %2425 }
 0xe51   :  { %v726_v63 = vadd.f32 1.0, %v2426_v5 }
 0xe53   :  { %2427 = vrcp.f32 %v726_v63 }
 0xe60   :  { %v2428_v6 = vpop.eup %2427 }
 0xe61   :  { %v730_v7 = vmul.f32 %v2428_v6, %v635_v51 }
 0xec1   :  { %v733_v3 = vpop.permute.xlu0 %732 }
 0xec2   :  { %v735_v4 = vmul.f32 %v2428_v6, %v733_v3 }
 0xec4   :  { %737 = vrot.lane.b32.xlu1 %v735_v4, %s2536_s22 }
 0xf36   :  { %v738_v9 = vpop.permute.xlu1 %737 }
 0xf37   :  { %v740_v11 = vadd.f32 %v738_v9, %v730_v7 }
 0xf39   :  { %2429 = vtanh.f32 %v740_v11 }
 0xf46   :  { %v2430_v12 = vpop.eup %2429 }
 0xf47   :  { %743 = vrot.lane.b32.xlu0 %v2430_v12, %s2536_s22 }
 0xf4b   :  { %79 = vperm.xlu0 %2381, %v45_v14  }
 0xfb9   :  { %v744_v15 = vpop.permute.xlu0 %743 }
 0xfba   :  { %v746_v16 = vmul.f32 %v2428_v6, %v744_v15 }
 0xfbc   :  { %748 = vrot.lane.b32.xlu1 %v746_v16, %s2537_s23 }
 0xfc6   :  { %v80_v27 = vpop.permute.xlu0 %79 }
 0xfc7   :  { %v99_v28 = vmul.f32 %v2648_v8, %v80_v27 }
 0xfc9   :  { %v113_v29 = vadd.f32 %v2654_v10, %v99_v28 }
0x102e   :  { %v749_v17 = vpop.permute.xlu1 %748 }
0x102f   :  { %752 = vst.msk [vmem:[#allocation2 + $0x28] sm:$0xff] %vm124_vm1, %v749_v17  ;;  %2243 = vmatmul.mubr.msk.f32.vlgmr.msra.gmra.mxu0 %vm124_vm1, %v749_v17 }
0x1030   :  { %2257 = vmatpush3.msra.mxu0 %v966_v13  ;;  %2264 = vmatprep.mubr.msk.f32.mxu0 %vm124_vm1, %v972_v19 }
0x1031   :  { %2258 = vmatprep.subr.mxu0 %v965_v18 }
0x1032   :  { %2259 = vmatpush3.msra.mxu0 %v965_v18 }
0x1033   :  { %2260 = vmatprep.subr.mxu0 %v964_v20 }
0x1034   :  { %2261 = vmatpush3.msra.mxu0 %v964_v20 }
0x1035   :  { %2262 = vmatprep.subr.mxu0 %v963_v21 }
0x1036   :  { %2263 = vmatpush3.msra.mxu0 %v963_v21  ;;  %v977_v26 = vld [vmem:[#allocation2 + $0x28] sm:$0xff] }
0x1037   :  { %2265 = vmatmul.mubr.msk.f32.vlgmr.msra.gmra.mxu0 %vm124_vm1, %v973_v22  ;;  %2298 = vmatprep.subr.mxu0 %v2533_v1 }
0x1038   :  { %2267 = vmatprep.mubr.msk.f32.mxu0 %vm124_vm1, %v974_v23  ;;  %2299 = vmatpush3.msra.mxu0 %v2800_v44 }
0x1039   :  { %2300 = vmatprep.subr.mxu0 %v2533_v1 }
0x103a   :  { %2301 = vmatpush3.msra.mxu0 %v2806_v45 }
0x103b   :  { %2268 = vmatmul.mubr.msk.f32.gmra.mxu0 %vm124_vm1, %v975_v24  ;;  %2302 = vmatprep.subr.mxu0 %v2533_v1 }
0x103c   :  { %2270 = vmatprep.mubr.msk.f32.mxu0 %vm124_vm1, %v976_v25  ;;  %2303 = vmatpush3.msra.mxu0 %v2813_v46 }
0x103d   :  { %2304 = vmatprep.subr.mxu0 %v2533_v1 }
0x103e   :  { %2305 = vmatpush3.msra.mxu0 %v2820_v47 }
0x103f   :  { %2271 = vmatmul.mubr.msk.f32.gmra.mxu0 %vm124_vm1, %v977_v26  ;;  %2320 = vmatprep.subr.mxu0 %v2533_v1 }
0x10ef   :  { %v823_v30 = vpop.f32.mrf.mxu0 }
0x10f0   :  { %v827_v31 = vadd.f32 %v823_v30, %v113_v29 }
0x10f1   :  { %v2244_v32 = vpop.f32.mrf.mxu0 }
0x10f2   :  { %2431 = vtanh.f32 %v827_v31  ;;  %v2042_v34 = vmul.f32 -1.442695, %v827_v31 }
0x10f4   :  { %2433 = vpow2.f32 %v2042_v34 }
0x10f7   :  { %v2850_v52 = vpop.f32.mrf.mxu0 }
0x10f8   :  { %v1082_v28 = vadd.f32 %v2850_v52, %v2855_v56 }
0x10f9   :  { %v1076_v55 = vpop.f32.mrf.mxu0 }
0x10fa   :  { %v1077_v57 = vadd.f32 %v2855_v56, %v1076_v55 }
0x10ff   :  { %v2432_v33 = vpop.eup %2431 }
0x1100   :  { %837 = vrot.lane.b32.xlu1 %v2432_v33, %s2536_s22 }
0x1101   :  { %v2434_v35 = vpop.eup %2433 }
0x1102   :  { %v831_v36 = vadd.f32 1.0, %v2434_v35 }
0x1104   :  { %2435 = vrcp.f32 %v831_v36 }
0x1111   :  { %v2436_v37 = vpop.eup %2435 }
0x1112   :  { %v835_v40 = vmul.f32 %v2436_v37, %v740_v11  ;;  %v46_v11 = vld [vmem:[%s3008_s0 + $0x38] sm:$0xff] }
0x1172   :  { %v838_v38 = vpop.permute.xlu1 %837 }
0x1173   :  { %v840_v39 = vmul.f32 %v2436_v37, %v838_v38 }
0x1175   :  { %842 = vrot.lane.b32.xlu0 %v840_v39, %s2536_s22 }
0x11e7   :  { %v843_v41 = vpop.permute.xlu0 %842 }
0x11e8   :  { %v2793_v42 = vadd.f32 %v843_v41, %v835_v40 }
0x11ea   :  { %2437 = vtanh.f32 %v2793_v42 }
0x11f7   :  { %v2438_v43 = vpop.eup %2437 }
0x11f8   :  { %848 = vrot.lane.b32.xlu1 %v2438_v43, %s2536_s22 }
0x126a   :  { %v849_v48 = vpop.permute.xlu1 %848 }
0x126b   :  { %v851_v49 = vmul.f32 %v2436_v37, %v849_v48 }
0x126d   :  { %853 = vrot.lane.b32.xlu0 %v851_v49, %s2537_s23 }
0x12df   :  { %v854_v50 = vpop.permute.xlu0 %853 }
0x12e0   :  { %857 = vst.msk [vmem:[#allocation2 + $0x30] sm:$0xff] %vm124_vm1, %v854_v50  ;;  %2254 = vmatmul.mubr.msk.f32.vlgmr.msra.gmra.mxu1 %vm124_vm1, %v854_v50 }
0x12e1   :  { %2277 = vmatpush3.msra.mxu1 %v2800_v44  ;;  %2284 = vmatprep.mubr.msk.f32.mxu1 %vm2534_vm0, %v2533_v1 }
0x12e2   :  { %2278 = vmatprep.subr.mxu1 %v2533_v1 }
0x12e3   :  { %2279 = vmatpush3.msra.mxu1 %v2806_v45 }
0x12e4   :  { %2280 = vmatprep.subr.mxu1 %v2533_v1 }
0x12e5   :  { %2281 = vmatpush3.msra.mxu1 %v2813_v46 }
0x12e6   :  { %2282 = vmatprep.subr.mxu1 %v2533_v1 }
0x12e7   :  { %2283 = vmatpush3.msra.mxu1 %v2820_v47  ;;  %v978_v51 = vld [vmem:[#allocation2 + $0x30] sm:$0xff] }
0x12e8   :  { %2285 = vmatmul.mubr.f32.vlgmr.msra.gmra.mxu1 %v2533_v1  ;;  %2273 = vmatprep.mubr.msk.f32.mxu0 %vm124_vm1, %v978_v51 }
0x12e9   :  { %2287 = vmatprep.subr.mxu1 %v2533_v1  ;;  %2295 = vmatprep.mubr.msk.f32.mxu1 %vm2534_vm0, %v2533_v1 }
0x12ea   :  { %2288 = vmatpush3.msra.mxu1 %v2800_v44 }
0x12eb   :  { %2289 = vmatprep.subr.mxu1 %v2533_v1 }
0x12ec   :  { %2290 = vmatpush3.msra.mxu1 %v2806_v45 }
0x12ed   :  { %2291 = vmatprep.subr.mxu1 %v2533_v1 }
0x12ee   :  { %2292 = vmatpush3.msra.mxu1 %v2813_v46 }
0x12ef   :  { %2293 = vmatprep.subr.mxu1 %v2533_v1 }
0x12f0   :  { %2294 = vmatpush3.msra.mxu1 %v2820_v47 }
0x12f1   :  { %2309 = vmatprep.subr.mxu1 %v2533_v1 }
0x13a0   :  { %v928_v53 = vpop.f32.mrf.mxu1 }
0x13a2   :  { %v2255_v54 = vpop.f32.mrf.mxu1 }
0x13a3   :  { %v2269_v54 = vpop.f32.mrf.mxu0 }
0x13a5   :  { %v1086_v55 = vpop.f32.mrf.mxu0 }
0x13a8   :  { %v1190_v0 = vpop.f32.mrf.mxu1 }
0x13a9   :  { %v1194_v58 = vadd.f32 %v1190_v0, %v1077_v57  ;;  %v2908_v57 = vpop.f32.mrf.mxu0 }
0x13aa   :  { %v2286_v59 = vpop.f32.mrf.mxu1 }
0x13ab   :  { %2439 = vtanh.f32 %v1194_v58  ;;  %v2054_v61 = vmul.f32 -1.442695, %v1194_v58  ;;  %v2910_v0 = vpop.f32.mrf.mxu0 }
0x13ad   :  { %2441 = vpow2.f32 %v2054_v61 }
0x13b8   :  { %v2440_v60 = vpop.eup %2439 }
0x13b9   :  { %1204 = vrot.lane.b32.xlu1 %v2440_v60, %s2536_s22  ;;  %v1087_v60 = vadd.f32 %v2855_v56, %v1086_v55 }
0x13ba   :  { %v2442_v2 = vpop.eup %2441 }
0x13bb   :  { %v1198_v62 = vadd.f32 1.0, %v2442_v2 }
0x13bd   :  { %2443 = vrcp.f32 %v1198_v62 }
0x13ca   :  { %v2444_v5 = vpop.eup %2443 }
0x13cb   :  { %v1202_v3 = vmul.f32 0.0, %v2444_v5 }
0x142b   :  { %v1205_v63 = vpop.permute.xlu1 %1204 }
0x142c   :  { %v1207_v6 = vmul.f32 %v2444_v5, %v1205_v63 }
0x142e   :  { %1209 = vrot.lane.b32.xlu0 %v1207_v6, %s2536_s22 }
0x14a0   :  { %v1210_v4 = vpop.permute.xlu0 %1209 }
0x14a1   :  { %v2860_v7 = vadd.f32 %v1210_v4, %v1202_v3 }
0x14a3   :  { %2445 = vtanh.f32 %v2860_v7 }
0x14b0   :  { %v2446_v9 = vpop.eup %2445 }
0x14b1   :  { %1215 = vrot.lane.b32.xlu1 %v2446_v9, %s2536_s22 }
0x14b5   :  { %84 = vperm.xlu1 %2382, %v46_v11  }
0x1523   :  { %v1216_v12 = vpop.permute.xlu1 %1215 }
0x1524   :  { %v1218_v13 = vmul.f32 %v2444_v5, %v1216_v12 }
0x1526   :  { %1221 = vrot.lane.b32.xlu0 %v1218_v13, %s2537_s23 }
0x1530   :  { %v85_v14 = vpop.permute.xlu1 %84 }
0x1531   :  { %v100_v15 = vmul.f32 %v2648_v8, %v85_v14 }
0x1533   :  { %v114_v16 = vadd.f32 %v2654_v10, %v100_v15 }
0x1535   :  { %v932_v17 = vadd.f32 %v928_v53, %v114_v16 }
0x1537   :  { %2447 = vtanh.f32 %v932_v17  ;;  %v2044_v19 = vmul.f32 -1.442695, %v932_v17 }
0x1539   :  { %2449 = vpow2.f32 %v2044_v19 }
0x1544   :  { %v2448_v18 = vpop.eup %2447 }
0x1545   :  { %942 = vrot.lane.b32.xlu0 %v2448_v18, %s2536_s22  ;;  %v1092_v18 = vadd.f32 %v2269_v54, %v2855_v56 }
0x1546   :  { %v2450_v8 = vpop.eup %2449 }
0x1547   :  { %v936_v10 = vadd.f32 1.0, %v2450_v8 }
0x1549   :  { %2451 = vrcp.f32 %v936_v10 }
0x1556   :  { %v2452_v21 = vpop.eup %2451 }
0x1557   :  { %v940_v24 = vmul.f32 %v2452_v21, %v2793_v42 }
0x1598   :  { %v1222_v20 = vpop.permute.xlu0 %1221 }
0x1599   :  { %2296 = vmatmul.mubr.msk.f32.vlgmr.msra.gmra.mxu1 %vm124_vm1, %v1222_v20 }
0x159a   :  { %2310 = vmatpush3.msra.mxu1 %v2800_v44  ;;  %2317 = vmatprep.mubr.msk.f32.mxu1 %vm2534_vm0, %v2533_v1 }
0x159b   :  { %2311 = vmatprep.subr.mxu1 %v2533_v1 }
0x159c   :  { %2312 = vmatpush3.msra.mxu1 %v2806_v45 }
0x159d   :  { %2313 = vmatprep.subr.mxu1 %v2533_v1 }
0x159e   :  { %2314 = vmatpush3.msra.mxu1 %v2813_v46 }
0x159f   :  { %2315 = vmatprep.subr.mxu1 %v2533_v1 }
0x15a0   :  { %2316 = vmatpush3.msra.mxu1 %v2820_v47 }
0x15a1   :  { %2331 = vmatprep.subr.mxu1 %v2533_v1 }
0x15b7   :  { %v943_v22 = vpop.permute.xlu0 %942 }
0x15b8   :  { %v945_v23 = vmul.f32 %v2452_v21, %v943_v22 }
0x15ba   :  { %947 = vrot.lane.b32.xlu0 %v945_v23, %s2536_s22 }
0x162c   :  { %v948_v25 = vpop.permute.xlu0 %947 }
0x162d   :  { %v950_v26 = vadd.f32 %v948_v25, %v940_v24 }
0x162f   :  { %2453 = vtanh.f32 %v950_v26 }
0x163c   :  { %v2454_v27 = vpop.eup %2453 }
0x163d   :  { %953 = vrot.lane.b32.xlu0 %v2454_v27, %s2536_s22 }
0x1659   :  { %v1291_v29 = vpop.f32.mrf.mxu1 }
0x165a   :  { %v1295_v30 = vadd.f32 %v1291_v29, %v1082_v28 }
0x165b   :  { %v2297_v31 = vpop.f32.mrf.mxu1 }
0x165c   :  { %2455 = vtanh.f32 %v1295_v30  ;;  %v2056_v35 = vmul.f32 -1.442695, %v1295_v30 }
0x165e   :  { %2457 = vpow2.f32 %v2056_v35 }
0x1669   :  { %v2456_v32 = vpop.eup %2455 }
0x166a   :  { %1305 = vrot.lane.b32.xlu1 %v2456_v32, %s2536_s22 }
0x166b   :  { %v2458_v36 = vpop.eup %2457 }
0x166c   :  { %v1299_v37 = vadd.f32 1.0, %v2458_v36 }
0x166e   :  { %2459 = vrcp.f32 %v1299_v37 }
0x167b   :  { %v2460_v38 = vpop.eup %2459 }
0x167c   :  { %v1303_v43 = vmul.f32 %v2460_v38, %v2860_v7 }
0x16af   :  { %v954_v33 = vpop.permute.xlu0 %953 }
0x16b0   :  { %v956_v34 = vmul.f32 %v2452_v21, %v954_v33 }
0x16b2   :  { %958 = vrot.lane.b32.xlu0 %v956_v34, %s2537_s23  ;;  %v1097_v34 = vadd.f32 %v2855_v56, %v2910_v0  ;;  %v1102_v0 = vadd.f32 %v2908_v57, %v2855_v56 }
0x16dc   :  { %v1306_v39 = vpop.permute.xlu1 %1305 }
0x16dd   :  { %v1308_v40 = vmul.f32 %v2460_v38, %v1306_v39 }
0x16df   :  { %1310 = vrot.lane.b32.xlu1 %v1308_v40, %s2536_s22 }
0x1724   :  { %v959_v41 = vpop.permute.xlu0 %958 }
0x1725   :  { %962 = vst.msk [vmem:[#allocation2 + $0x38] sm:$0xff] %vm124_vm1, %v959_v41 }
0x172c   :  { %v979_v42 = vld [vmem:[#allocation2 + $0x38] sm:$0xff] }
0x172d   :  { %2274 = vmatmul.mubr.msk.f32.gmra.mxu0 %vm124_vm1, %v979_v42 }
0x172e   :  { %2306 = vmatprep.mubr.msk.f32.mxu0 %vm2534_vm0, %v2533_v1 }
0x1751   :  { %v1311_v48 = vpop.permute.xlu1 %1310 }
0x1752   :  { %v1313_v49 = vadd.f32 %v1311_v48, %v1303_v43 }
0x1754   :  { %2461 = vtanh.f32 %v1313_v49 }
0x1761   :  { %v2462_v50 = vpop.eup %2461 }
0x1762   :  { %1316 = vrot.lane.b32.xlu1 %v2462_v50, %s2536_s22 }
0x17d4   :  { %v1317_v51 = vpop.permute.xlu1 %1316 }
0x17d5   :  { %v1319_v52 = vmul.f32 %v2460_v38, %v1317_v51 }
0x17d7   :  { %1322 = vrot.lane.b32.xlu1 %v1319_v52, %s2537_s23 }
0x17ed   :  { %v2912_v58 = vpop.f32.mrf.mxu0 }
0x17ef   :  { %v2914_v59 = vpop.f32.mrf.mxu0 }
0x1849   :  { %v1323_v53 = vpop.permute.xlu1 %1322 }
0x184a   :  { %2307 = vmatmul.mubr.msk.f32.vlgmr.msra.gmra.mxu0 %vm124_vm1, %v1323_v53 }
0x184b   :  { %2321 = vmatpush3.msra.mxu0 %v2800_v44  ;;  %2328 = vmatprep.mubr.msk.f32.mxu0 %vm2534_vm0, %v2533_v1 }
0x184c   :  { %2322 = vmatprep.subr.mxu0 %v2533_v1 }
0x184d   :  { %2323 = vmatpush3.msra.mxu0 %v2806_v45 }
0x184e   :  { %2324 = vmatprep.subr.mxu0 %v2533_v1 }
0x184f   :  { %2325 = vmatpush3.msra.mxu0 %v2813_v46 }
0x1850   :  { %2326 = vmatprep.subr.mxu0 %v2533_v1 }
0x1851   :  { %2327 = vmatpush3.msra.mxu0 %v2820_v47 }
0x1852   :  { %2342 = vmatprep.subr.mxu0 %v2533_v1 }
0x190a   :  { %v1392_v61 = vpop.f32.mrf.mxu0 }
0x190b   :  { %v1396_v2 = vadd.f32 %v1392_v61, %v1087_v60 }
0x190c   :  { %v2308_v62 = vpop.f32.mrf.mxu0 }
0x190d   :  { %2463 = vtanh.f32 %v1396_v2  ;;  %v2058_v63 = vmul.f32 -1.442695, %v1396_v2 }
0x190f   :  { %2465 = vpow2.f32 %v2058_v63 }
0x191a   :  { %v2464_v5 = vpop.eup %2463 }
0x191b   :  { %1406 = vrot.lane.b32.xlu0 %v2464_v5, %s2536_s22 }
0x191c   :  { %v2466_v6 = vpop.eup %2465 }
0x191d   :  { %v1400_v3 = vadd.f32 1.0, %v2466_v6 }
0x191f   :  { %2467 = vrcp.f32 %v1400_v3 }
0x192c   :  { %v2468_v4 = vpop.eup %2467 }
0x192d   :  { %v1404_v11 = vmul.f32 %v2468_v4, %v1313_v49 }
0x198d   :  { %v1407_v7 = vpop.permute.xlu0 %1406 }
0x198e   :  { %v1409_v9 = vmul.f32 %v2468_v4, %v1407_v7 }
0x1990   :  { %1411 = vrot.lane.b32.xlu1 %v1409_v9, %s2536_s22 }
0x1a02   :  { %v1412_v12 = vpop.permute.xlu1 %1411 }
0x1a03   :  { %v1414_v13 = vadd.f32 %v1412_v12, %v1404_v11  ;;  %v1107_v12 = vadd.f32 %v2855_v56, %v2914_v59 }
0x1a05   :  { %2469 = vtanh.f32 %v1414_v13 }
0x1a12   :  { %v2470_v14 = vpop.eup %2469 }
0x1a13   :  { %1417 = vrot.lane.b32.xlu0 %v2470_v14, %s2536_s22 }
0x1a85   :  { %v1418_v15 = vpop.permute.xlu0 %1417 }
0x1a86   :  { %v1420_v16 = vmul.f32 %v2468_v4, %v1418_v15 }
0x1a88   :  { %1423 = vrot.lane.b32.xlu1 %v1420_v16, %s2537_s23 }
0x1afa   :  { %v1424_v17 = vpop.permute.xlu1 %1423 }
0x1afb   :  { %2318 = vmatmul.mubr.msk.f32.vlgmr.msra.gmra.mxu1 %vm124_vm1, %v1424_v17 }
0x1afc   :  { %2332 = vmatpush3.msra.mxu1 %v2800_v44  ;;  %2339 = vmatprep.mubr.msk.f32.mxu1 %vm2534_vm0, %v2533_v1 }
0x1afd   :  { %2333 = vmatprep.subr.mxu1 %v2533_v1 }
0x1afe   :  { %2334 = vmatpush3.msra.mxu1 %v2806_v45 }
0x1aff   :  { %2335 = vmatprep.subr.mxu1 %v2533_v1 }
0x1b00   :  { %2336 = vmatpush3.msra.mxu1 %v2813_v46 }
0x1b01   :  { %2337 = vmatprep.subr.mxu1 %v2533_v1 }
0x1b02   :  { %2338 = vmatpush3.msra.mxu1 %v2820_v47 }
0x1b03   :  { %2353 = vmatprep.subr.mxu1 %v2533_v1 }
0x1bbb   :  { %v1493_v19 = vpop.f32.mrf.mxu1 }
0x1bbc   :  { %v1497_v20 = vadd.f32 %v1493_v19, %v1092_v18 }
0x1bbd   :  { %v2319_v8 = vpop.f32.mrf.mxu1 }
0x1bbe   :  { %2471 = vtanh.f32 %v1497_v20  ;;  %v2060_v21 = vmul.f32 -1.442695, %v1497_v20 }
0x1bc0   :  { %2473 = vpow2.f32 %v2060_v21 }
0x1bcb   :  { %v2472_v10 = vpop.eup %2471 }
0x1bcc   :  { %1507 = vrot.lane.b32.xlu0 %v2472_v10, %s2536_s22 }
0x1bcd   :  { %v2474_v22 = vpop.eup %2473 }
0x1bce   :  { %v1501_v23 = vadd.f32 1.0, %v2474_v22 }
0x1bd0   :  { %2475 = vrcp.f32 %v1501_v23 }
0x1bdd   :  { %v2476_v24 = vpop.eup %2475 }
0x1bde   :  { %v1505_v27 = vmul.f32 %v2476_v24, %v1414_v13 }
0x1c3e   :  { %v1508_v25 = vpop.permute.xlu0 %1507 }
0x1c3f   :  { %v1510_v26 = vmul.f32 %v2476_v24, %v1508_v25 }
0x1c41   :  { %1512 = vrot.lane.b32.xlu1 %v1510_v26, %s2536_s22 }
0x1cb3   :  { %v1513_v28 = vpop.permute.xlu1 %1512 }
0x1cb4   :  { %v1515_v29 = vadd.f32 %v1513_v28, %v1505_v27  ;;  %v1112_v27 = vadd.f32 %v2912_v58, %v2855_v56  ;;  %v1929_v58 = vld [vmem:[%s3015_s7 + $0x18] sm:$0xff] }
0x1cb6   :  { %2477 = vtanh.f32 %v1515_v29 }
0x1cc3   :  { %v2478_v30 = vpop.eup %2477 }
0x1cc4   :  { %1518 = vrot.lane.b32.xlu0 %v2478_v30, %s2536_s22 }
0x1d36   :  { %v1519_v31 = vpop.permute.xlu0 %1518 }
0x1d37   :  { %v1521_v32 = vmul.f32 %v2476_v24, %v1519_v31 }
0x1d39   :  { %1524 = vrot.lane.b32.xlu1 %v1521_v32, %s2537_s23 }
0x1dab   :  { %v1525_v33 = vpop.permute.xlu1 %1524 }
0x1dac   :  { %2329 = vmatmul.mubr.msk.f32.vlgmr.msra.gmra.mxu0 %vm124_vm1, %v1525_v33 }
0x1dad   :  { %2343 = vmatpush3.msra.mxu0 %v2800_v44  ;;  %2350 = vmatprep.mubr.msk.f32.mxu0 %vm2534_vm0, %v2533_v1 }
0x1dae   :  { %2344 = vmatprep.subr.mxu0 %v2533_v1 }
0x1daf   :  { %2345 = vmatpush3.msra.mxu0 %v2806_v45 }
0x1db0   :  { %2346 = vmatprep.subr.mxu0 %v2533_v1 }
0x1db1   :  { %2347 = vmatpush3.msra.mxu0 %v2813_v46 }
0x1db2   :  { %2348 = vmatprep.subr.mxu0 %v2533_v1 }
0x1db3   :  { %2349 = vmatpush3.msra.mxu0 %v2820_v47 }
0x1db4   :  { %2364 = vmatprep.subr.mxu0 %v2533_v1 }
0x1e6c   :  { %v1594_v35 = vpop.f32.mrf.mxu0 }
0x1e6d   :  { %v1598_v36 = vadd.f32 %v1594_v35, %v1097_v34 }
0x1e6e   :  { %v2330_v37 = vpop.f32.mrf.mxu0 }
0x1e6f   :  { %2479 = vtanh.f32 %v1598_v36  ;;  %v2062_v39 = vmul.f32 -1.442695, %v1598_v36 }
0x1e71   :  { %2481 = vpow2.f32 %v2062_v39 }
0x1e7c   :  { %v2480_v38 = vpop.eup %2479 }
0x1e7d   :  { %1608 = vrot.lane.b32.xlu0 %v2480_v38, %s2536_s22 }
0x1e7e   :  { %v2482_v40 = vpop.eup %2481 }
0x1e7f   :  { %v1602_v41 = vadd.f32 1.0, %v2482_v40  ;;  %v1928_v40 = vld [vmem:[%s3015_s7 + $0x10] sm:$0xff] }
0x1e81   :  { %2483 = vrcp.f32 %v1602_v41  ;;  %v1927_v41 = vld [vmem:[%s3015_s7 + $0x8] sm:$0xff] }
0x1e8e   :  { %v2484_v42 = vpop.eup %2483 }
0x1e8f   :  { %v1606_v49 = vmul.f32 %v2484_v42, %v1515_v29 }
0x1eef   :  { %v1609_v43 = vpop.permute.xlu0 %1608 }
0x1ef0   :  { %v1611_v48 = vmul.f32 %v2484_v42, %v1609_v43 }
0x1ef2   :  { %1613 = vrot.lane.b32.xlu1 %v1611_v48, %s2536_s22 }
0x1f64   :  { %v1614_v50 = vpop.permute.xlu1 %1613 }
0x1f65   :  { %v1616_v51 = vadd.f32 %v1614_v50, %v1606_v49 }
0x1f67   :  { %2485 = vtanh.f32 %v1616_v51 }
0x1f74   :  { %v2486_v52 = vpop.eup %2485 }
0x1f75   :  { %1619 = vrot.lane.b32.xlu0 %v2486_v52, %s2536_s22 }
0x1fe7   :  { %v1620_v53 = vpop.permute.xlu0 %1619 }
0x1fe8   :  { %v1622_v54 = vmul.f32 %v2484_v42, %v1620_v53  ;;  %v1926_v42 = vld [vmem:[%s3015_s7] sm:$0xff]  ;;  %s2020_s7 = sshll.u32 %s2538_s17, 4  ;;  %s2021_s7 = int_to_ptr.vmem [resolvable:$true] %s2020_s7 }
0x1fe9   :  { %p2516_p1 = scmp.lt.s32.totalorder %s2021_s7, %s2021_s7 }
0x1fea   :  { %1625 = vrot.lane.b32.xlu1 %v1622_v54, %s2537_s23 }
0x205c   :  { %v1626_v55 = vpop.permute.xlu1 %1625 }
0x205d   :  { %2340 = vmatmul.mubr.msk.f32.vlgmr.msra.gmra.mxu1 %vm124_vm1, %v1626_v55 }
0x205e   :  { %2354 = vmatpush3.msra.mxu1 %v2800_v44  ;;  %2361 = vmatprep.mubr.msk.f32.mxu1 %vm2534_vm0, %v2533_v1 }
0x205f   :  { %2355 = vmatprep.subr.mxu1 %v2533_v1 }
0x2060   :  { %2356 = vmatpush3.msra.mxu1 %v2806_v45 }
0x2061   :  { %2357 = vmatprep.subr.mxu1 %v2533_v1 }
0x2062   :  { %2358 = vmatpush3.msra.mxu1 %v2813_v46 }
0x2063   :  { %2359 = vmatprep.subr.mxu1 %v2533_v1 }
0x2064   :  { %2360 = vmatpush3.msra.mxu1 %v2820_v47 }
0x211d   :  { %v1695_v60 = vpop.f32.mrf.mxu1 }
0x211e   :  { %v1699_v44 = vadd.f32 %v1695_v60, %v1102_v0 }
0x211f   :  { %v2341_v61 = vpop.f32.mrf.mxu1 }
0x2120   :  { %2487 = vtanh.f32 %v1699_v44  ;;  %v2064_v62 = vmul.f32 -1.442695, %v1699_v44 }
0x2122   :  { %2489 = vpow2.f32 %v2064_v62 }
0x212d   :  { %v2488_v2 = vpop.eup %2487 }
0x212e   :  { %1709 = vrot.lane.b32.xlu0 %v2488_v2, %s2536_s22 }
0x212f   :  { %v2490_v45 = vpop.eup %2489 }
0x2130   :  { %v1703_v5 = vadd.f32 1.0, %v2490_v45 }
0x2132   :  { %2491 = vrcp.f32 %v1703_v5 }
0x213f   :  { %v2492_v46 = vpop.eup %2491 }
0x2140   :  { %v1707_v47 = vmul.f32 %v2492_v46, %v1616_v51  ;;  %v2069_v51 = vld [vmem:[%s3016_s8] ss:$0 sm:$0xff] }
0x21a0   :  { %v1710_v63 = vpop.permute.xlu0 %1709 }
0x21a1   :  { %v1712_v6 = vmul.f32 %v2492_v46, %v1710_v63 }
0x21a3   :  { %1714 = vrot.lane.b32.xlu1 %v1712_v6, %s2536_s22 }
0x2215   :  { %v1715_v3 = vpop.permute.xlu1 %1714 }
0x2216   :  { %v1717_v57 = vadd.f32 %v1715_v3, %v1707_v47 }
0x2218   :  { %2493 = vtanh.f32 %v1717_v57 }
0x2225   :  { %v2494_v4 = vpop.eup %2493 }
0x2226   :  { %1720 = vrot.lane.b32.xlu0 %v2494_v4, %s2536_s22 }
0x2298   :  { %v1721_v7 = vpop.permute.xlu0 %1720 }
0x2299   :  { %v1723_v9 = vmul.f32 %v2492_v46, %v1721_v7 }
0x229b   :  { %1726 = vrot.lane.b32.xlu1 %v1723_v9, %s2537_s23 }
0x230d   :  { %v1727_v11 = vpop.permute.xlu1 %1726 }
0x230e   :  { %2351 = vmatmul.mubr.msk.f32.vlgmr.msra.gmra.mxu0 %vm124_vm1, %v1727_v11 }
0x230f   :  { %2372 = vmatprep.mubr.msk.f32.mxu0 %vm2534_vm0, %v2533_v1  ;;  %2365 = vmatpush3.msra.mxu0 %v1929_v58 }
0x2310   :  { %2366 = vmatprep.subr.mxu0 %v2533_v1 }
0x2311   :  { %2367 = vmatpush3.msra.mxu0 %v1928_v40 }
0x2312   :  { %2368 = vmatprep.subr.mxu0 %v2533_v1 }
0x2313   :  { %2369 = vmatpush3.msra.mxu0 %v1927_v41 }
0x2314   :  { %2370 = vmatprep.subr.mxu0 %v2533_v1 }
0x2315   :  { %2371 = vmatpush3.msra.mxu0 %v1926_v42 }
0x23ce   :  { %v1796_v13 = vpop.f32.mrf.mxu0 }
0x23cf   :  { %v1800_v14 = vadd.f32 %v1796_v13, %v1107_v12 }
0x23d0   :  { %v2352_v15 = vpop.f32.mrf.mxu0 }
0x23d1   :  { %2495 = vtanh.f32 %v1800_v14  ;;  %v2066_v17 = vmul.f32 -1.442695, %v1800_v14 }
0x23d3   :  { %2497 = vpow2.f32 %v2066_v17 }
0x23de   :  { %v2496_v16 = vpop.eup %2495 }
0x23df   :  { %1810 = vrot.lane.b32.xlu0 %v2496_v16, %s2536_s22 }
0x23e0   :  { %v2498_v18 = vpop.eup %2497 }
0x23e1   :  { %v1804_v19 = vadd.f32 1.0, %v2498_v18 }
0x23e3   :  { %2499 = vrcp.f32 %v1804_v19 }
0x23f0   :  { %v2500_v20 = vpop.eup %2499 }
0x23f1   :  { %v1808_v21 = vmul.f32 %v2500_v20, %v1717_v57 }
0x2451   :  { %v1811_v8 = vpop.permute.xlu0 %1810 }
0x2452   :  { %v1813_v10 = vmul.f32 %v2500_v20, %v1811_v8 }
0x2454   :  { %1815 = vrot.lane.b32.xlu1 %v1813_v10, %s2536_s22 }
0x24c6   :  { %v1816_v22 = vpop.permute.xlu1 %1815 }
0x24c7   :  { %v1818_v59 = vadd.f32 %v1816_v22, %v1808_v21 }
0x24c9   :  { %2501 = vtanh.f32 %v1818_v59 }
0x24d6   :  { %v2502_v23 = vpop.eup %2501 }
0x24d7   :  { %1821 = vrot.lane.b32.xlu0 %v2502_v23, %s2536_s22 }
0x2549   :  { %v1822_v24 = vpop.permute.xlu0 %1821 }
0x254a   :  { %v1824_v25 = vmul.f32 %v2500_v20, %v1822_v24 }
0x254c   :  { %1827 = vrot.lane.b32.xlu1 %v1824_v25, %s2537_s23 }
0x25be   :  { %v1828_v26 = vpop.permute.xlu1 %1827 }
0x25bf   :  { %2362 = vmatmul.mubr.msk.f32.vlgmr.msra.gmra.mxu1 %vm124_vm1, %v1828_v26 }
0x267f   :  { %v1897_v28 = vpop.f32.mrf.mxu1 }
0x2680   :  { %v1901_v29 = vadd.f32 %v1897_v28, %v1112_v27 }
0x2681   :  { %v2363_v30 = vpop.f32.mrf.mxu1 }
0x2682   :  { %2503 = vtanh.f32 %v1901_v29  ;;  %v2068_v32 = vmul.f32 -1.442695, %v1901_v29 }
0x2684   :  { %2505 = vpow2.f32 %v2068_v32 }
0x268f   :  { %v2504_v31 = vpop.eup %2503 }
0x2690   :  { %1911 = vrot.lane.b32.xlu0 %v2504_v31, %s2536_s22 }
0x2691   :  { %v2506_v33 = vpop.eup %2505 }
0x2692   :  { %v1905_v34 = vadd.f32 1.0, %v2506_v33 }
0x2694   :  { %2507 = vrcp.f32 %v1905_v34 }
0x26a1   :  { %v2508_v35 = vpop.eup %2507 }
0x26a2   :  { %v1909_v38 = vmul.f32 %v2508_v35, %v1818_v59 }
0x2702   :  { %v1912_v36 = vpop.permute.xlu0 %1911 }
0x2703   :  { %v1914_v37 = vmul.f32 %v2508_v35, %v1912_v36 }
0x2705   :  { %1916 = vrot.lane.b32.xlu1 %v1914_v37, %s2536_s22 }
0x2777   :  { %v1917_v39 = vpop.permute.xlu1 %1916 }
0x2778   :  { %v1919_v56 = vadd.f32 %v1917_v39, %v1909_v38 }
0x277a   :  { %2509 = vtanh.f32 %v1919_v56 }
0x2787   :  { %v2510_v43 = vpop.eup %2509 }
0x2788   :  { %1922 = vrot.lane.b32.xlu0 %v2510_v43, %s2536_s22  ;;  %s2511_s22 = scalar_lea.vmem %s2021_s7, 32 }
0x2789   :  { %p2512_p0 = scmp.ne.s32.totalorder %s2021_s7, %s2511_s22  ;;  %p2517_p2 = scmp.lt.s32.totalorder %s2511_s22, %s2511_s22 }
0x278b   :  { %p2518_p3 = por %p2517_p2, %p2516_p1 }
0x278d   :  { %p2519_p4 = pnand %p2518_p3, %p2512_p0 }
0x27fa   :  { %v1923_v48 = vpop.permute.xlu0 %1922 }
0x27fb   :  { %v1925_v49 = vmul.f32 %v2508_v35, %v1923_v48 }
0x27fd   :  { %1938 = vrot.lane.b32.xlu1 %v1925_v49, %s2537_s23 }
0x286f   :  { %v1939_v50 = vpop.permute.xlu1 %1938 }
0x2870   :  { %2373 = vmatmul.mubr.msk.f32.vlgmr.msra.gmra.mxu0 %vm124_vm1, %v1939_v50 }
0x2930   :  { %v2008_v52 = vpop.f32.mrf.mxu0 }
0x2931   :  { %v2009_v1 = vadd.f32 %v2069_v51, %v2008_v52 }
0x2932   :  { %v2374_v53 = vpop.f32.mrf.mxu0 }
0x2933   :  { %2013 = vst.msk [vmem:[#allocation4] sm:$0x3] %vm2012_vm2, %v2009_v1 }
0x2934   :  { %2522 = shalt.err (!%p2519_p4)
}
0x2935   :  { %2023 = dma.vmem_to_hbm [thread:$0]  %s2021_s7, 32, %s3017_s9, [#allocation5]  }
0x2936   :  { %2531 = dma.done.wait [#allocation5], 32  }
0x2937   :  { %2532 = vsyncadd [#allocation5], 4294967264 }
0x2938   :  { %2027 = vsyncpa [#allocation5], 1 }

</bundles_post_ra>
